<compile_context>
chip_gen: v7x
topology: tpu7x:2x2x1
jax: 0.10.0
libtpu: 0.0.40
codegen_flags: <defaults>
</compile_context>

<pallas_src>
import functools
import math

import jax
import jax.numpy as jnp
from jax import lax
from jax.experimental import pallas as pl
from jax.experimental.pallas import tpu as pltpu

# ---- small synthetic "BERT" config ----
HIDDEN = 128
N_HEADS = 2
HEAD_DIM = HIDDEN // N_HEADS
FFN = 256
VOCAB = 512          # stands in for tokenizer.vocab_size
N_LAYERS = 2
MAX_POS = 64
LN_EPS = 1e-12

# packed per-layer vector layout (all offsets are lane-tile (128) aligned)
_OFF_BQKV = 0
_OFF_BO = 3 * HIDDEN
_OFF_LN1G = 4 * HIDDEN
_OFF_LN1B = 5 * HIDDEN
_OFF_B1 = 6 * HIDDEN
_OFF_B2 = 6 * HIDDEN + FFN
_OFF_LN2G = 7 * HIDDEN + FFN
_OFF_LN2B = 8 * HIDDEN + FFN
_VEC_W = 9 * HIDDEN + FFN


# ---------------- in-kernel helpers (f32 elementwise math) ----------------
def _layernorm(x, g, b):
    mu = jnp.mean(x, axis=-1, keepdims=True)
    d = x - mu
    var = jnp.mean(d * d, axis=-1, keepdims=True)
    return d * lax.rsqrt(var + LN_EPS) * g + b


def _gelu(x):
    # tanh-approx GELU (BERT intermediate activation)
    return 0.5 * x * (1.0 + jnp.tanh(0.7978845608028654 * (x + 0.044715 * x * x * x)))


# ---------------- fused full-encoder-stack kernel ----------------
def _encoder_stack_kernel(x_ref, bias_ref, embln_ref,
                          wqkv_ref, wo_ref, w1_ref, w2_ref, vec_ref,
                          o_ref, *, bblk, seq):
    l = pl.program_id(1)

    # layer 0: fused embedding LayerNorm initializes the VMEM-resident hidden state
    @pl.when(l == 0)
    def _():
        o_ref[...] = _layernorm(x_ref[...],
                                embln_ref[:, :HIDDEN], embln_ref[:, HIDDEN:])

    h = o_ref[...]                          # (R, H) f32, resident across the layer axis
    bias = bias_ref[...]                    # (Bblk, 1, S) additive attn-mask bias

    # packed per-layer small vectors (one DMA, lane-aligned slices)
    bqkv = vec_ref[:, _OFF_BQKV:_OFF_BQKV + 3 * HIDDEN]
    bo = vec_ref[:, _OFF_BO:_OFF_BO + HIDDEN]
    ln1g = vec_ref[:, _OFF_LN1G:_OFF_LN1G + HIDDEN]
    ln1b = vec_ref[:, _OFF_LN1B:_OFF_LN1B + HIDDEN]
    b1 = vec_ref[:, _OFF_B1:_OFF_B1 + FFN]
    b2 = vec_ref[:, _OFF_B2:_OFF_B2 + HIDDEN]
    ln2g = vec_ref[:, _OFF_LN2G:_OFF_LN2G + HIDDEN]
    ln2b = vec_ref[:, _OFF_LN2B:_OFF_LN2B + HIDDEN]

    # fused QKV projection: bf16 operands, f32 accumulation on the MXU
    qkv = jnp.dot(h.astype(jnp.bfloat16), wqkv_ref[...],
                  preferred_element_type=jnp.float32) + bqkv              # (R, 3H)

    scale = 1.0 / math.sqrt(HEAD_DIM)
    attn = None
    for hd in range(N_HEADS):               # small static unroll over heads
        q0 = hd * HEAD_DIM
        q = qkv[:, q0:q0 + HEAD_DIM].reshape(bblk, seq, HEAD_DIM).astype(jnp.bfloat16)
        k = qkv[:, HIDDEN + q0:HIDDEN + q0 + HEAD_DIM]
        k = k.reshape(bblk, seq, HEAD_DIM).astype(jnp.bfloat16)
        v = qkv[:, 2 * HIDDEN + q0:2 * HIDDEN + q0 + HEAD_DIM]
        v = v.reshape(bblk, seq, HEAD_DIM).astype(jnp.bfloat16)
        # batched q @ k^T over the batch-block dimension
        s = lax.dot_general(q, k, (((2,), (2,)), ((0,), (0,))),
                            preferred_element_type=jnp.float32)           # (Bblk, S, S)
        s = s * scale + bias
        s = s - jnp.max(s, axis=-1, keepdims=True)
        p = jnp.exp(s)
        p = p * pl.reciprocal(jnp.sum(p, axis=-1, keepdims=True), approx=True)
        ctx = lax.dot_general(p.astype(jnp.bfloat16), v,
                              (((2,), (1,)), ((0,), (0,))),
                              preferred_element_type=jnp.float32)         # (Bblk, S, D)
        # per-head output-projection accumulation (no concat / relayout)
        part = jnp.dot(ctx.reshape(bblk * seq, HEAD_DIM).astype(jnp.bfloat16),
                       wo_ref[q0:q0 + HEAD_DIM, :],
                       preferred_element_type=jnp.float32)                # (R, H)
        attn = part if attn is None else attn + part
    attn = attn + bo

    h1 = _layernorm(h + attn, ln1g, ln1b)

    ff = jnp.dot(h1.astype(jnp.bfloat16), w1_ref[...],
                 preferred_element_type=jnp.float32) + b1
    ff = _gelu(ff)
    ff = jnp.dot(ff.astype(jnp.bfloat16), w2_ref[...],
                 preferred_element_type=jnp.float32) + b2
    o_ref[...] = _layernorm(h1 + ff, ln2g, ln2b)


def encoder_stack(x, bias, enc):
    M, H = x.shape
    B = bias.shape[0]
    S = M // B
    L = enc["wqkv"].shape[0]

    # biggest per-step batch block with <= ~256 rows (MXU fill / per-step amortization)
    bblk = 1
    for c in range(1, B + 1):
        if B % c == 0 and c * S <= 256:
            bblk = c
    R = bblk * S

    kern = functools.partial(_encoder_stack_kernel, bblk=bblk, seq=S)
    wspec = lambda shape: pl.BlockSpec(shape, lambda i, l: (l, 0, 0))

    flops = 2 * M * L * (H * 3 * H + 2 * S * H + H * H + 2 * H * FFN)
    trans = L * (B * N_HEADS * S * S + M * FFN)
    bytes_acc = (L * (H * 3 * H + H * H + 2 * H * FFN) * 2
                 + L * _VEC_W * 4 + 2 * M * H * 4 + B * S * 4)

    return pl.pallas_call(
        kern,
        out_shape=jax.ShapeDtypeStruct((M, H), jnp.float32),
        grid=(B // bblk, L),
        in_specs=[
            pl.BlockSpec((R, H), lambda i, l: (i, 0)),           # x (resident per row block)
            pl.BlockSpec((bblk, 1, S), lambda i, l: (i, 0, 0)),  # attention-mask bias
            pl.BlockSpec((1, 2 * H), lambda i, l: (0, 0)),       # emb LN gamma|beta
            wspec((None, H, 3 * H)),                             # wqkv per layer (bf16)
            wspec((None, H, H)),                                 # wo  per layer (bf16)
            wspec((None, H, FFN)),                               # w1  per layer (bf16)
            wspec((None, FFN, H)),                               # w2  per layer (bf16)
            wspec((None, 1, _VEC_W)),                            # packed biases + LN vecs
        ],
        out_specs=pl.BlockSpec((R, H), lambda i, l: (i, 0)),
        compiler_params=pltpu.CompilerParams(
            dimension_semantics=("parallel", "arbitrary"),
            vmem_limit_bytes=32 * 1024 * 1024),
        cost_estimate=pl.CostEstimate(flops=flops, transcendentals=trans,
                                      bytes_accessed=bytes_acc),
    )(x, bias, enc["emb_ln"], enc["wqkv"], enc["wo"], enc["w1"], enc["w2"], enc["vec"])


# ---------------- classifier + softmax (inference path) ----------------
def _classify_softmax_kernel(x_ref, w_ref, b_ref, o_ref):
    logits = jnp.dot(x_ref[...].astype(jnp.bfloat16), w_ref[...],
                     preferred_element_type=jnp.float32) + b_ref[...]
    logits = logits - jnp.max(logits, axis=-1, keepdims=True)
    e = jnp.exp(logits)
    o_ref[...] = e / jnp.sum(e, axis=-1, keepdims=True)


def classify_softmax(x, w, b):
    M, K = x.shape
    V = w.shape[1]
    tm = 256
    while tm > 8 and M % tm:
        tm //= 2
    if M % tm:
        tm = M
    return pl.pallas_call(
        _classify_softmax_kernel,
        out_shape=jax.ShapeDtypeStruct((M, V), jnp.float32),
        grid=(M // tm,),
        in_specs=[pl.BlockSpec((tm, K), lambda i: (i, 0)),
                  pl.BlockSpec((K, V), lambda i: (0, 0)),
                  pl.BlockSpec((1, V), lambda i: (0, 0))],
        out_specs=pl.BlockSpec((tm, V), lambda i: (i, 0)),
        compiler_params=pltpu.CompilerParams(dimension_semantics=("parallel",)),
        cost_estimate=pl.CostEstimate(flops=2 * M * K * V, transcendentals=M * V,
                                      bytes_accessed=M * K * 4 + K * V * 2 + M * V * 4),
    )(x, w, b)


# -------- classifier + masked cross-entropy, vocab-tiled (training path) --------
def _masked_ce_kernel(x_ref, w_ref, b_ref, y_ref, rw_ref, loss_ref,
                      m_acc, l_acc, t_acc, *, tn):
    j = pl.program_id(0)

    @pl.when(j == 0)
    def _():
        m_acc[...] = jnp.full_like(m_acc, -jnp.inf)
        l_acc[...] = jnp.zeros_like(l_acc)
        t_acc[...] = jnp.zeros_like(t_acc)

    logits = jnp.dot(x_ref[...].astype(jnp.bfloat16), w_ref[...],
                     preferred_element_type=jnp.float32) + b_ref[...]     # (Nm, tn)

    # target logit (global column index) accumulated across vocab tiles
    cols = lax.broadcasted_iota(jnp.int32, logits.shape, 1) + j * tn
    t_acc[...] += jnp.sum(jnp.where(cols == y_ref[...], logits, 0.0),
                          axis=-1, keepdims=True)

    # online logsumexp across vocab tiles
    m_new = jnp.maximum(m_acc[...], jnp.max(logits, axis=-1, keepdims=True))
    l_acc[...] = (l_acc[...] * jnp.exp(m_acc[...] - m_new)
                  + jnp.sum(jnp.exp(logits - m_new), axis=-1, keepdims=True))
    m_acc[...] = m_new

    @pl.when(j == pl.num_programs(0) - 1)
    def _():
        lse = m_acc[...] + jnp.log(l_acc[...])
        loss_ref[...] = jnp.sum(rw_ref[...] * (lse - t_acc[...]),
                                axis=0, keepdims=True)                    # (1, 1)


def masked_cross_entropy(x_masked, w, b, labels):
    Nm, K = x_masked.shape
    V = w.shape[1]
    nm_pad = max(8, -(-Nm // 8) * 8)                       # sublane-aligned row count
    x_p = jnp.zeros((nm_pad, K), jnp.float32).at[:Nm].set(x_masked)
    y_p = jnp.full((nm_pad, 1), -1, jnp.int32).at[:Nm, 0].set(labels.astype(jnp.int32))
    rw = jnp.zeros((nm_pad, 1), jnp.float32).at[:Nm, 0].set(1.0 / Nm)

    # vocab tile; real ~21k vocab would use tn ~ 2048 (padded) for the same kernel
    tn = 256 if (V % 256 == 0 and V > 256) else V
    kern = functools.partial(_masked_ce_kernel, tn=tn)

    out = pl.pallas_call(
        kern,
        out_shape=jax.ShapeDtypeStruct((1, 1), jnp.float32),
        grid=(V // tn,),
        in_specs=[pl.BlockSpec((nm_pad, K), lambda j: (0, 0)),
                  pl.BlockSpec((K, tn), lambda j: (0, j)),
                  pl.BlockSpec((1, tn), lambda j: (0, j)),
                  pl.BlockSpec((nm_pad, 1), lambda j: (0, 0)),
                  pl.BlockSpec((nm_pad, 1), lambda j: (0, 0))],
        out_specs=pl.BlockSpec((1, 1), lambda j: (0, 0)),
        scratch_shapes=[pltpu.VMEM((nm_pad, 1), jnp.float32)] * 3,
        compiler_params=pltpu.CompilerParams(dimension_semantics=("arbitrary",)),
        cost_estimate=pl.CostEstimate(flops=2 * nm_pad * K * V,
                                      transcendentals=nm_pad * V,
                                      bytes_accessed=nm_pad * K * 4 + K * V * 2 + V * 4),
    )(x_p, w, b, y_p, rw)
    return out[0, 0]


# ---------------- parameters (stacked per-layer weights, packed vectors) ----------------
def init_params(key):
    keys = iter(jax.random.split(key, 16))

    def dense(shape):
        return 0.02 * jax.random.normal(next(keys), shape, jnp.float32)

    def w16(shape):
        return dense(shape).astype(jnp.bfloat16)      # MXU weights stored in bf16

    L = N_LAYERS
    vec = jnp.zeros((L, 1, _VEC_W), jnp.float32)      # biases 0, LN betas 0
    vec = vec.at[:, :, _OFF_LN1G:_OFF_LN1G + HIDDEN].set(1.0)   # LN gammas 1
    vec = vec.at[:, :, _OFF_LN2G:_OFF_LN2G + HIDDEN].set(1.0)
    emb_ln = jnp.concatenate([jnp.ones((1, HIDDEN), jnp.float32),
                              jnp.zeros((1, HIDDEN), jnp.float32)], axis=1)

    return {
        "word_emb": dense((VOCAB, HIDDEN)),
        "pos_emb": dense((MAX_POS, HIDDEN)),
        "type_emb": dense((2, HIDDEN)),
        "cls_w": w16((HIDDEN, VOCAB)),                # self.classify = nn.Linear(hidden, vocab)
        "cls_b": jnp.zeros((1, VOCAB), jnp.float32),
        "enc": {
            "emb_ln": emb_ln,                         # embedding LN gamma|beta, fused in-kernel
            "wqkv": w16((L, HIDDEN, 3 * HIDDEN)),     # fused Wq|Wk|Wv, stacked over layers
            "wo": w16((L, HIDDEN, HIDDEN)),
            "w1": w16((L, HIDDEN, FFN)),
            "w2": w16((L, FFN, HIDDEN)),
            "vec": vec,                               # packed [bqkv|bo|ln1g|ln1b|b1|b2|ln2g|ln2b]
        },
    }


# ---------------- forward (mirrors LanguageModel.forward) ----------------
def bert_lm_forward(params, input_ids, attention_mask=None,
                    masked_positions=None, y=None):
    B, S = input_ids.shape
    if attention_mask is None:
        attention_mask = jnp.ones((B, S), jnp.float32)

    # embeddings (index gathers are glue; LN is fused into the encoder kernel)
    x = (jnp.take(params["word_emb"], input_ids, axis=0)
         + params["pos_emb"][None, :S, :]
         + params["type_emb"][0][None, None, :]).astype(jnp.float32)
    x = x.reshape(B * S, HIDDEN)

    # additive attention-mask bias, shape (B, 1, S)
    bias = ((1.0 - attention_mask.astype(jnp.float32)) * -1e9).reshape(B, 1, S)

    # embedding LN + ALL transformer layers in one fused pallas_call
    x = encoder_stack(x, bias, params["enc"])

    if y is not None and masked_positions is not None:
        batch_indices, pos_indices = masked_positions
        # gather masked hidden states (glue); project + CE fused, vocab-tiled
        xm = x.reshape(B, S, HIDDEN)[batch_indices, pos_indices]   # (Nm, H)
        return masked_cross_entropy(xm, params["cls_w"], params["cls_b"], y)
    else:
        probs = classify_softmax(x, params["cls_w"], params["cls_b"])
        return probs.reshape(B, S, VOCAB)


if __name__ == "__main__":
    key = jax.random.PRNGKey(0)
    pkey, ikey, ykey = jax.random.split(key, 3)
    params = init_params(pkey)

    B, S = 2, 8
    input_ids = jax.random.randint(ikey, (B, S), 0, VOCAB, dtype=jnp.int32)
    attention_mask = jnp.ones((B, S), jnp.int32)

    # inference path: softmax over vocab
    probs = bert_lm_forward(params, input_ids, attention_mask)
    probs = jax.block_until_ready(probs)
    assert probs.shape == (B, S, VOCAB)
    assert bool(jnp.all(jnp.isfinite(probs)))
    assert bool(jnp.allclose(probs.sum(-1), 1.0, atol=1e-3))

    # training path: masked cross-entropy
    batch_idx = jnp.array([0, 0, 1, 1], jnp.int32)
    pos_idx = jnp.array([1, 3, 2, 5], jnp.int32)
    labels = jax.random.randint(ykey, (4,), 0, VOCAB, dtype=jnp.int32)
    loss = bert_lm_forward(params, input_ids, attention_mask,
                           masked_positions=(batch_idx, pos_idx), y=labels)
    loss = jax.block_until_ready(loss)
    assert loss.shape == () and bool(jnp.isfinite(loss))

    print("KERNEL_OK")
</pallas_src>

<mosaic_0001>
module attributes {stable_mosaic.version = 11 : i64} {
  func.func @_encoder_stack_kernel(%arg0: i32, %arg1: i32, %arg2: memref<16x128xf32, #tpu.memory_space<vmem>>, %arg3: memref<2x1x8xf32, #tpu.memory_space<vmem>>, %arg4: memref<1x256xf32, #tpu.memory_space<vmem>>, %arg5: memref<1x128x384xbf16, #tpu.memory_space<vmem>>, %arg6: memref<1x128x128xbf16, #tpu.memory_space<vmem>>, %arg7: memref<1x128x256xbf16, #tpu.memory_space<vmem>>, %arg8: memref<1x256x128xbf16, #tpu.memory_space<vmem>>, %arg9: memref<1x1x1408xf32, #tpu.memory_space<vmem>>, %arg10: memref<16x128xf32, #tpu.memory_space<vmem>>) attributes {dimension_semantics = [#tpu.dimension_semantics<parallel>, #tpu.dimension_semantics<arbitrary>], iteration_bounds = array<i64: 1, 2>, scalar_prefetch = 0 : i64, scratch_operands = 0 : i64, tpu.core_type = #tpu.core_type<tc>, window_params = [{transform_indices = @transform_0, window_bounds = array<i64: 16, 128>}, {transform_indices = @transform_1, window_bounds = array<i64: 2, 1, 8>}, {pipeline_mode = #tpu.pipeline_mode<synchronous>, transform_indices = @transform_2, window_bounds = array<i64: 1, 256>}, {transform_indices = @transform_3, window_bounds = array<i64: 1, 128, 384>}, {transform_indices = @transform_4, window_bounds = array<i64: 1, 128, 128>}, {transform_indices = @transform_5, window_bounds = array<i64: 1, 128, 256>}, {transform_indices = @transform_6, window_bounds = array<i64: 1, 256, 128>}, {transform_indices = @transform_7, window_bounds = array<i64: 1, 1, 1408>}, {transform_indices = @transform_8, window_bounds = array<i64: 16, 128>}]} {
    %c0_i32 = arith.constant 0 : i32
    %0 = arith.cmpi eq, %arg1, %c0_i32 : i32
    %1 = arith.extui %0 : i1 to i32
    %c0_i32_0 = arith.constant 0 : i32
    %2 = arith.cmpi ne, %1, %c0_i32_0 : i32
    scf.if %2 {
      %c0_66 = arith.constant 0 : index
      %c0_67 = arith.constant 0 : index
      %160 = vector.load %arg2[%c0_66, %c0_67] : memref<16x128xf32, #tpu.memory_space<vmem>>, vector<16x128xf32>
      %c0_68 = arith.constant 0 : index
      %c0_69 = arith.constant 0 : index
      %161 = vector.load %arg4[%c0_68, %c0_69] : memref<1x256xf32, #tpu.memory_space<vmem>>, vector<1x128xf32>
      %c0_70 = arith.constant 0 : index
      %c128 = arith.constant 128 : index
      %162 = vector.load %arg4[%c0_70, %c128] : memref<1x256xf32, #tpu.memory_space<vmem>>, vector<1x128xf32>
      %cst_71 = arith.constant dense<0.000000e+00> : vector<16xf32>
      %163 = vector.multi_reduction <add>, %160, %cst_71 [1] : vector<16x128xf32> to vector<16xf32>
      %164 = vector.shape_cast %163 : vector<16xf32> to vector<16x1xf32>
      %cst_72 = arith.constant 1.280000e+02 : f32
      %165 = vector.broadcast %cst_72 : f32 to vector<16x1xf32>
      %166 = arith.divf %164, %165 : vector<16x1xf32>
      %167 = vector.broadcast %166 : vector<16x1xf32> to vector<16x128xf32>
      %168 = arith.subf %160, %167 : vector<16x128xf32>
      %169 = arith.mulf %168, %168 : vector<16x128xf32>
      %cst_73 = arith.constant dense<0.000000e+00> : vector<16xf32>
      %170 = vector.multi_reduction <add>, %169, %cst_73 [1] : vector<16x128xf32> to vector<16xf32>
      %171 = vector.shape_cast %170 : vector<16xf32> to vector<16x1xf32>
      %cst_74 = arith.constant 1.280000e+02 : f32
      %172 = vector.broadcast %cst_74 : f32 to vector<16x1xf32>
      %173 = arith.divf %171, %172 : vector<16x1xf32>
      %cst_75 = arith.constant 9.99999996E-13 : f32
      %174 = vector.broadcast %cst_75 : f32 to vector<16x1xf32>
      %175 = arith.addf %173, %174 : vector<16x1xf32>
      %176 = math.rsqrt %175 : vector<16x1xf32>
      %177 = vector.broadcast %176 : vector<16x1xf32> to vector<16x128xf32>
      %178 = arith.mulf %168, %177 : vector<16x128xf32>
      %179 = vector.broadcast %161 : vector<1x128xf32> to vector<16x128xf32>
      %180 = arith.mulf %178, %179 : vector<16x128xf32>
      %181 = vector.broadcast %162 : vector<1x128xf32> to vector<16x128xf32>
      %182 = arith.addf %180, %181 : vector<16x128xf32>
      %c0_76 = arith.constant 0 : index
      %c0_77 = arith.constant 0 : index
      %183 = vector.load %arg10[%c0_76, %c0_77] : memref<16x128xf32, #tpu.memory_space<vmem>>, vector<16x128xf32>
      tpu.vector_store %arg10[%c0_76, %c0_77], %182 {strides = array<i32>} : memref<16x128xf32, #tpu.memory_space<vmem>>, vector<16x128xf32>,
    } else {
    }
    %c0 = arith.constant 0 : index
    %c0_1 = arith.constant 0 : index
    %3 = vector.load %arg10[%c0, %c0_1] : memref<16x128xf32, #tpu.memory_space<vmem>>, vector<16x128xf32>
    %c0_2 = arith.constant 0 : index
    %c0_3 = arith.constant 0 : index
    %c0_4 = arith.constant 0 : index
    %4 = vector.load %arg3[%c0_2, %c0_3, %c0_4] : memref<2x1x8xf32, #tpu.memory_space<vmem>>, vector<2x1x8xf32>
    %c0_5 = arith.constant 0 : index
    %c0_6 = arith.constant 0 : index
    %c0_7 = arith.constant 0 : index
    %5 = vector.load %arg9[%c0_5, %c0_6, %c0_7] : memref<1x1x1408xf32, #tpu.memory_space<vmem>>, vector<1x1x384xf32>
    %6 = vector.shape_cast %5 : vector<1x1x384xf32> to vector<1x384xf32>
    %c0_8 = arith.constant 0 : index
    %c0_9 = arith.constant 0 : index
    %c384 = arith.constant 384 : index
    %7 = vector.load %arg9[%c0_8, %c0_9, %c384] : memref<1x1x1408xf32, #tpu.memory_space<vmem>>, vector<1x1x128xf32>
    %8 = vector.shape_cast %7 : vector<1x1x128xf32> to vector<1x128xf32>
    %c0_10 = arith.constant 0 : index
    %c0_11 = arith.constant 0 : index
    %c512 = arith.constant 512 : index
    %9 = vector.load %arg9[%c0_10, %c0_11, %c512] : memref<1x1x1408xf32, #tpu.memory_space<vmem>>, vector<1x1x128xf32>
    %10 = vector.shape_cast %9 : vector<1x1x128xf32> to vector<1x128xf32>
    %c0_12 = arith.constant 0 : index
    %c0_13 = arith.constant 0 : index
    %c640 = arith.constant 640 : index
    %11 = vector.load %arg9[%c0_12, %c0_13, %c640] : memref<1x1x1408xf32, #tpu.memory_space<vmem>>, vector<1x1x128xf32>
    %12 = vector.shape_cast %11 : vector<1x1x128xf32> to vector<1x128xf32>
    %c0_14 = arith.constant 0 : index
    %c0_15 = arith.constant 0 : index
    %c768 = arith.constant 768 : index
    %13 = vector.load %arg9[%c0_14, %c0_15, %c768] : memref<1x1x1408xf32, #tpu.memory_space<vmem>>, vector<1x1x256xf32>
    %14 = vector.shape_cast %13 : vector<1x1x256xf32> to vector<1x256xf32>
    %c0_16 = arith.constant 0 : index
    %c0_17 = arith.constant 0 : index
    %c1024 = arith.constant 1024 : index
    %15 = vector.load %arg9[%c0_16, %c0_17, %c1024] : memref<1x1x1408xf32, #tpu.memory_space<vmem>>, vector<1x1x128xf32>
    %16 = vector.shape_cast %15 : vector<1x1x128xf32> to vector<1x128xf32>
    %c0_18 = arith.constant 0 : index
    %c0_19 = arith.constant 0 : index
    %c1152 = arith.constant 1152 : index
    %17 = vector.load %arg9[%c0_18, %c0_19, %c1152] : memref<1x1x1408xf32, #tpu.memory_space<vmem>>, vector<1x1x128xf32>
    %18 = vector.shape_cast %17 : vector<1x1x128xf32> to vector<1x128xf32>
    %c0_20 = arith.constant 0 : index
    %c0_21 = arith.constant 0 : index
    %c1280 = arith.constant 1280 : index
    %19 = vector.load %arg9[%c0_20, %c0_21, %c1280] : memref<1x1x1408xf32, #tpu.memory_space<vmem>>, vector<1x1x128xf32>
    %20 = vector.shape_cast %19 : vector<1x1x128xf32> to vector<1x128xf32>
    %21 = arith.truncf %3 : vector<16x128xf32> to vector<16x128xbf16>
    %c0_22 = arith.constant 0 : index
    %c0_23 = arith.constant 0 : index
    %c0_24 = arith.constant 0 : index
    %22 = vector.load %arg5[%c0_22, %c0_23, %c0_24] : memref<1x128x384xbf16, #tpu.memory_space<vmem>>, vector<1x128x384xbf16>
    %23 = vector.shape_cast %22 : vector<1x128x384xbf16> to vector<128x384xbf16>
    %cst = arith.constant dense<0.000000e+00> : vector<16x384xf32>
    %24 = tpu.matmul %21, %23, %cst {dimension_numbers = #tpu.dot_dimension_numbers<[1], [0], [0], [1], [0, 0, 1, 1], [], []>} : vector<16x128xbf16>, vector<128x384xbf16>, vector<16x384xf32> -> vector<16x384xf32>
    %25 = vector.broadcast %6 : vector<1x384xf32> to vector<16x384xf32>
    %26 = arith.addf %24, %25 : vector<16x384xf32>
    %27 = vector.extract_strided_slice %26 {offsets = [0, 0], sizes = [16, 64], strides = [1, 1]} : vector<16x384xf32> to vector<16x64xf32>
    %28 = vector.shape_cast %27 : vector<16x64xf32> to vector<2x8x64xf32>
    %29 = arith.truncf %28 : vector<2x8x64xf32> to vector<2x8x64xbf16>
    %30 = vector.extract_strided_slice %26 {offsets = [0, 128], sizes = [16, 64], strides = [1, 1]} : vector<16x384xf32> to vector<16x64xf32>
    %31 = vector.shape_cast %30 : vector<16x64xf32> to vector<2x8x64xf32>
    %32 = arith.truncf %31 : vector<2x8x64xf32> to vector<2x8x64xbf16>
    %33 = vector.extract_strided_slice %26 {offsets = [0, 256], sizes = [16, 64], strides = [1, 1]} : vector<16x384xf32> to vector<16x64xf32>
    %34 = vector.shape_cast %33 : vector<16x64xf32> to vector<2x8x64xf32>
    %35 = arith.truncf %34 : vector<2x8x64xf32> to vector<2x8x64xbf16>
    %cst_25 = arith.constant dense<0.000000e+00> : vector<2x8x8xf32>
    %36 = tpu.matmul %29, %32, %cst_25 {dimension_numbers = #tpu.dot_dimension_numbers<[2], [2], [1], [1], [0, 0, 0, 1, 1, 1], [0], [0]>} : vector<2x8x64xbf16>, vector<2x8x64xbf16>, vector<2x8x8xf32> -> vector<2x8x8xf32>
    %cst_26 = arith.constant 1.250000e-01 : f32
    %37 = vector.broadcast %cst_26 : f32 to vector<2x8x8xf32>
    %38 = arith.mulf %36, %37 : vector<2x8x8xf32>
    %39 = vector.broadcast %4 : vector<2x1x8xf32> to vector<2x8x8xf32>
    %40 = arith.addf %38, %39 : vector<2x8x8xf32>
    %cst_27 = arith.constant dense<0xFF800000> : vector<2x8xf32>
    %41 = vector.multi_reduction <maximumf>, %40, %cst_27 [2] : vector<2x8x8xf32> to vector<2x8xf32>
    %42 = vector.shape_cast %41 : vector<2x8xf32> to vector<2x8x1xf32>
    %43 = vector.broadcast %42 : vector<2x8x1xf32> to vector<2x8x8xf32>
    %44 = arith.subf %40, %43 : vector<2x8x8xf32>
    %45 = math.exp %44 : vector<2x8x8xf32>
    %cst_28 = arith.constant dense<0.000000e+00> : vector<2x8xf32>
    %46 = vector.multi_reduction <add>, %45, %cst_28 [2] : vector<2x8x8xf32> to vector<2x8xf32>
    %47 = vector.shape_cast %46 : vector<2x8xf32> to vector<2x8x1xf32>
    %48 = tpu.reciprocal %47 {approx = true} : vector<2x8x1xf32> -> vector<2x8x1xf32>
    %49 = vector.broadcast %48 : vector<2x8x1xf32> to vector<2x8x8xf32>
    %50 = arith.mulf %45, %49 : vector<2x8x8xf32>
    %51 = arith.truncf %50 : vector<2x8x8xf32> to vector<2x8x8xbf16>
    %cst_29 = arith.constant dense<0.000000e+00> : vector<2x8x64xf32>
    %52 = tpu.matmul %51, %35, %cst_29 {dimension_numbers = #tpu.dot_dimension_numbers<[2], [1], [1], [2], [0, 0, 0, 1, 1, 2], [0], [0]>} : vector<2x8x8xbf16>, vector<2x8x64xbf16>, vector<2x8x64xf32> -> vector<2x8x64xf32>
    %53 = vector.shape_cast %52 : vector<2x8x64xf32> to vector<16x64xf32>
    %54 = arith.truncf %53 : vector<16x64xf32> to vector<16x64xbf16>
    %c0_30 = arith.constant 0 : index
    %c0_31 = arith.constant 0 : index
    %c0_32 = arith.constant 0 : index
    %55 = vector.load %arg6[%c0_30, %c0_31, %c0_32] : memref<1x128x128xbf16, #tpu.memory_space<vmem>>, vector<1x64x128xbf16>
    %56 = vector.shape_cast %55 : vector<1x64x128xbf16> to vector<64x128xbf16>
    %cst_33 = arith.constant dense<0.000000e+00> : vector<16x128xf32>
    %57 = tpu.matmul %54, %56, %cst_33 {dimension_numbers = #tpu.dot_dimension_numbers<[1], [0], [0], [1], [0, 0, 1, 1], [], []>} : vector<16x64xbf16>, vector<64x128xbf16>, vector<16x128xf32> -> vector<16x128xf32>
    %58 = vector.extract_strided_slice %26 {offsets = [0, 64], sizes = [16, 64], strides = [1, 1]} : vector<16x384xf32> to vector<16x64xf32>
    %59 = vector.shape_cast %58 : vector<16x64xf32> to vector<2x8x64xf32>
    %60 = arith.truncf %59 : vector<2x8x64xf32> to vector<2x8x64xbf16>
    %61 = vector.extract_strided_slice %26 {offsets = [0, 192], sizes = [16, 64], strides = [1, 1]} : vector<16x384xf32> to vector<16x64xf32>
    %62 = vector.shape_cast %61 : vector<16x64xf32> to vector<2x8x64xf32>
    %63 = arith.truncf %62 : vector<2x8x64xf32> to vector<2x8x64xbf16>
    %64 = vector.extract_strided_slice %26 {offsets = [0, 320], sizes = [16, 64], strides = [1, 1]} : vector<16x384xf32> to vector<16x64xf32>
    %65 = vector.shape_cast %64 : vector<16x64xf32> to vector<2x8x64xf32>
    %66 = arith.truncf %65 : vector<2x8x64xf32> to vector<2x8x64xbf16>
    %cst_34 = arith.constant dense<0.000000e+00> : vector<2x8x8xf32>
    %67 = tpu.matmul %60, %63, %cst_34 {dimension_numbers = #tpu.dot_dimension_numbers<[2], [2], [1], [1], [0, 0, 0, 1, 1, 1], [0], [0]>} : vector<2x8x64xbf16>, vector<2x8x64xbf16>, vector<2x8x8xf32> -> vector<2x8x8xf32>
    %cst_35 = arith.constant 1.250000e-01 : f32
    %68 = vector.broadcast %cst_35 : f32 to vector<2x8x8xf32>
    %69 = arith.mulf %67, %68 : vector<2x8x8xf32>
    %70 = vector.broadcast %4 : vector<2x1x8xf32> to vector<2x8x8xf32>
    %71 = arith.addf %69, %70 : vector<2x8x8xf32>
    %cst_36 = arith.constant dense<0xFF800000> : vector<2x8xf32>
    %72 = vector.multi_reduction <maximumf>, %71, %cst_36 [2] : vector<2x8x8xf32> to vector<2x8xf32>
    %73 = vector.shape_cast %72 : vector<2x8xf32> to vector<2x8x1xf32>
    %74 = vector.broadcast %73 : vector<2x8x1xf32> to vector<2x8x8xf32>
    %75 = arith.subf %71, %74 : vector<2x8x8xf32>
    %76 = math.exp %75 : vector<2x8x8xf32>
    %cst_37 = arith.constant dense<0.000000e+00> : vector<2x8xf32>
    %77 = vector.multi_reduction <add>, %76, %cst_37 [2] : vector<2x8x8xf32> to vector<2x8xf32>
    %78 = vector.shape_cast %77 : vector<2x8xf32> to vector<2x8x1xf32>
    %79 = tpu.reciprocal %78 {approx = true} : vector<2x8x1xf32> -> vector<2x8x1xf32>
    %80 = vector.broadcast %79 : vector<2x8x1xf32> to vector<2x8x8xf32>
    %81 = arith.mulf %76, %80 : vector<2x8x8xf32>
    %82 = arith.truncf %81 : vector<2x8x8xf32> to vector<2x8x8xbf16>
    %cst_38 = arith.constant dense<0.000000e+00> : vector<2x8x64xf32>
    %83 = tpu.matmul %82, %66, %cst_38 {dimension_numbers = #tpu.dot_dimension_numbers<[2], [1], [1], [2], [0, 0, 0, 1, 1, 2], [0], [0]>} : vector<2x8x8xbf16>, vector<2x8x64xbf16>, vector<2x8x64xf32> -> vector<2x8x64xf32>
    %84 = vector.shape_cast %83 : vector<2x8x64xf32> to vector<16x64xf32>
    %85 = arith.truncf %84 : vector<16x64xf32> to vector<16x64xbf16>
    %c0_39 = arith.constant 0 : index
    %c64 = arith.constant 64 : index
    %c0_40 = arith.constant 0 : index
    %86 = vector.load %arg6[%c0_39, %c64, %c0_40] : memref<1x128x128xbf16, #tpu.memory_space<vmem>>, vector<1x64x128xbf16>
    %87 = vector.shape_cast %86 : vector<1x64x128xbf16> to vector<64x128xbf16>
    %cst_41 = arith.constant dense<0.000000e+00> : vector<16x128xf32>
    %88 = tpu.matmul %85, %87, %cst_41 {dimension_numbers = #tpu.dot_dimension_numbers<[1], [0], [0], [1], [0, 0, 1, 1], [], []>} : vector<16x64xbf16>, vector<64x128xbf16>, vector<16x128xf32> -> vector<16x128xf32>
    %89 = arith.addf %57, %88 : vector<16x128xf32>
    %90 = vector.broadcast %8 : vector<1x128xf32> to vector<16x128xf32>
    %91 = arith.addf %89, %90 : vector<16x128xf32>
    %92 = arith.addf %3, %91 : vector<16x128xf32>
    %cst_42 = arith.constant dense<0.000000e+00> : vector<16xf32>
    %93 = vector.multi_reduction <add>, %92, %cst_42 [1] : vector<16x128xf32> to vector<16xf32>
    %94 = vector.shape_cast %93 : vector<16xf32> to vector<16x1xf32>
    %cst_43 = arith.constant 1.280000e+02 : f32
    %95 = vector.broadcast %cst_43 : f32 to vector<16x1xf32>
    %96 = arith.divf %94, %95 : vector<16x1xf32>
    %97 = vector.broadcast %96 : vector<16x1xf32> to vector<16x128xf32>
    %98 = arith.subf %92, %97 : vector<16x128xf32>
    %99 = arith.mulf %98, %98 : vector<16x128xf32>
    %cst_44 = arith.constant dense<0.000000e+00> : vector<16xf32>
    %100 = vector.multi_reduction <add>, %99, %cst_44 [1] : vector<16x128xf32> to vector<16xf32>
    %101 = vector.shape_cast %100 : vector<16xf32> to vector<16x1xf32>
    %cst_45 = arith.constant 1.280000e+02 : f32
    %102 = vector.broadcast %cst_45 : f32 to vector<16x1xf32>
    %103 = arith.divf %101, %102 : vector<16x1xf32>
    %cst_46 = arith.constant 9.99999996E-13 : f32
    %104 = vector.broadcast %cst_46 : f32 to vector<16x1xf32>
    %105 = arith.addf %103, %104 : vector<16x1xf32>
    %106 = math.rsqrt %105 : vector<16x1xf32>
    %107 = vector.broadcast %106 : vector<16x1xf32> to vector<16x128xf32>
    %108 = arith.mulf %98, %107 : vector<16x128xf32>
    %109 = vector.broadcast %10 : vector<1x128xf32> to vector<16x128xf32>
    %110 = arith.mulf %108, %109 : vector<16x128xf32>
    %111 = vector.broadcast %12 : vector<1x128xf32> to vector<16x128xf32>
    %112 = arith.addf %110, %111 : vector<16x128xf32>
    %113 = arith.truncf %112 : vector<16x128xf32> to vector<16x128xbf16>
    %c0_47 = arith.constant 0 : index
    %c0_48 = arith.constant 0 : index
    %c0_49 = arith.constant 0 : index
    %114 = vector.load %arg7[%c0_47, %c0_48, %c0_49] : memref<1x128x256xbf16, #tpu.memory_space<vmem>>, vector<1x128x256xbf16>
    %115 = vector.shape_cast %114 : vector<1x128x256xbf16> to vector<128x256xbf16>
    %cst_50 = arith.constant dense<0.000000e+00> : vector<16x256xf32>
    %116 = tpu.matmul %113, %115, %cst_50 {dimension_numbers = #tpu.dot_dimension_numbers<[1], [0], [0], [1], [0, 0, 1, 1], [], []>} : vector<16x128xbf16>, vector<128x256xbf16>, vector<16x256xf32> -> vector<16x256xf32>
    %117 = vector.broadcast %14 : vector<1x256xf32> to vector<16x256xf32>
    %118 = arith.addf %116, %117 : vector<16x256xf32>
    %cst_51 = arith.constant 5.000000e-01 : f32
    %119 = vector.broadcast %cst_51 : f32 to vector<16x256xf32>
    %120 = arith.mulf %119, %118 : vector<16x256xf32>
    %cst_52 = arith.constant 4.471500e-02 : f32
    %121 = vector.broadcast %cst_52 : f32 to vector<16x256xf32>
    %122 = arith.mulf %121, %118 : vector<16x256xf32>
    %123 = arith.mulf %122, %118 : vector<16x256xf32>
    %124 = arith.mulf %123, %118 : vector<16x256xf32>
    %125 = arith.addf %118, %124 : vector<16x256xf32>
    %cst_53 = arith.constant 0.797884583 : f32
    %126 = vector.broadcast %cst_53 : f32 to vector<16x256xf32>
    %127 = arith.mulf %126, %125 : vector<16x256xf32>
    %128 = math.tanh %127 : vector<16x256xf32>
    %cst_54 = arith.constant 1.000000e+00 : f32
    %129 = vector.broadcast %cst_54 : f32 to vector<16x256xf32>
    %130 = arith.addf %129, %128 : vector<16x256xf32>
    %131 = arith.mulf %120, %130 : vector<16x256xf32>
    %132 = arith.truncf %131 : vector<16x256xf32> to vector<16x256xbf16>
    %c0_55 = arith.constant 0 : index
    %c0_56 = arith.constant 0 : index
    %c0_57 = arith.constant 0 : index
    %133 = vector.load %arg8[%c0_55, %c0_56, %c0_57] : memref<1x256x128xbf16, #tpu.memory_space<vmem>>, vector<1x256x128xbf16>
    %134 = vector.shape_cast %133 : vector<1x256x128xbf16> to vector<256x128xbf16>
    %cst_58 = arith.constant dense<0.000000e+00> : vector<16x128xf32>
    %135 = tpu.matmul %132, %134, %cst_58 {dimension_numbers = #tpu.dot_dimension_numbers<[1], [0], [0], [1], [0, 0, 1, 1], [], []>} : vector<16x256xbf16>, vector<256x128xbf16>, vector<16x128xf32> -> vector<16x128xf32>
    %136 = vector.broadcast %16 : vector<1x128xf32> to vector<16x128xf32>
    %137 = arith.addf %135, %136 : vector<16x128xf32>
    %138 = arith.addf %112, %137 : vector<16x128xf32>
    %cst_59 = arith.constant dense<0.000000e+00> : vector<16xf32>
    %139 = vector.multi_reduction <add>, %138, %cst_59 [1] : vector<16x128xf32> to vector<16xf32>
    %140 = vector.shape_cast %139 : vector<16xf32> to vector<16x1xf32>
    %cst_60 = arith.constant 1.280000e+02 : f32
    %141 = vector.broadcast %cst_60 : f32 to vector<16x1xf32>
    %142 = arith.divf %140, %141 : vector<16x1xf32>
    %143 = vector.broadcast %142 : vector<16x1xf32> to vector<16x128xf32>
    %144 = arith.subf %138, %143 : vector<16x128xf32>
    %145 = arith.mulf %144, %144 : vector<16x128xf32>
    %cst_61 = arith.constant dense<0.000000e+00> : vector<16xf32>
    %146 = vector.multi_reduction <add>, %145, %cst_61 [1] : vector<16x128xf32> to vector<16xf32>
    %147 = vector.shape_cast %146 : vector<16xf32> to vector<16x1xf32>
    %cst_62 = arith.constant 1.280000e+02 : f32
    %148 = vector.broadcast %cst_62 : f32 to vector<16x1xf32>
    %149 = arith.divf %147, %148 : vector<16x1xf32>
    %cst_63 = arith.constant 9.99999996E-13 : f32
    %150 = vector.broadcast %cst_63 : f32 to vector<16x1xf32>
    %151 = arith.addf %149, %150 : vector<16x1xf32>
    %152 = math.rsqrt %151 : vector<16x1xf32>
    %153 = vector.broadcast %152 : vector<16x1xf32> to vector<16x128xf32>
    %154 = arith.mulf %144, %153 : vector<16x128xf32>
    %155 = vector.broadcast %18 : vector<1x128xf32> to vector<16x128xf32>
    %156 = arith.mulf %154, %155 : vector<16x128xf32>
    %157 = vector.broadcast %20 : vector<1x128xf32> to vector<16x128xf32>
    %158 = arith.addf %156, %157 : vector<16x128xf32>
    %c0_64 = arith.constant 0 : index
    %c0_65 = arith.constant 0 : index
    %159 = vector.load %arg10[%c0_64, %c0_65] : memref<16x128xf32, #tpu.memory_space<vmem>>, vector<16x128xf32>
    tpu.vector_store %arg10[%c0_64, %c0_65], %158 {strides = array<i32>} : memref<16x128xf32, #tpu.memory_space<vmem>>, vector<16x128xf32>,
    return
  }
  func.func @transform_0(%arg0: i32, %arg1: i32) -> (i32, i32) {
    %c0_i32 = arith.constant 0 : i32
    %c0_i32_0 = arith.constant 0 : i32
    return %arg0, %c0_i32 : i32, i32
  }
  func.func @transform_1(%arg0: i32, %arg1: i32) -> (i32, i32, i32) {
    %c0_i32 = arith.constant 0 : i32
    %c0_i32_0 = arith.constant 0 : i32
    %c0_i32_1 = arith.constant 0 : i32
    return %arg0, %c0_i32, %c0_i32_0 : i32, i32, i32
  }
  func.func @transform_2(%arg0: i32, %arg1: i32) -> (i32, i32) {
    %c0_i32 = arith.constant 0 : i32
    %c0_i32_0 = arith.constant 0 : i32
    %c0_i32_1 = arith.constant 0 : i32
    return %c0_i32, %c0_i32_0 : i32, i32
  }
  func.func @transform_3(%arg0: i32, %arg1: i32) -> (i32, i32, i32) {
    %c0_i32 = arith.constant 0 : i32
    %c0_i32_0 = arith.constant 0 : i32
    %c0_i32_1 = arith.constant 0 : i32
    return %arg1, %c0_i32, %c0_i32_0 : i32, i32, i32
  }
  func.func @transform_4(%arg0: i32, %arg1: i32) -> (i32, i32, i32) {
    %c0_i32 = arith.constant 0 : i32
    %c0_i32_0 = arith.constant 0 : i32
    %c0_i32_1 = arith.constant 0 : i32
    return %arg1, %c0_i32, %c0_i32_0 : i32, i32, i32
  }
  func.func @transform_5(%arg0: i32, %arg1: i32) -> (i32, i32, i32) {
    %c0_i32 = arith.constant 0 : i32
    %c0_i32_0 = arith.constant 0 : i32
    %c0_i32_1 = arith.constant 0 : i32
    return %arg1, %c0_i32, %c0_i32_0 : i32, i32, i32
  }
  func.func @transform_6(%arg0: i32, %arg1: i32) -> (i32, i32, i32) {
    %c0_i32 = arith.constant 0 : i32
    %c0_i32_0 = arith.constant 0 : i32
    %c0_i32_1 = arith.constant 0 : i32
    return %arg1, %c0_i32, %c0_i32_0 : i32, i32, i32
  }
  func.func @transform_7(%arg0: i32, %arg1: i32) -> (i32, i32, i32) {
    %c0_i32 = arith.constant 0 : i32
    %c0_i32_0 = arith.constant 0 : i32
    %c0_i32_1 = arith.constant 0 : i32
    return %arg1, %c0_i32, %c0_i32_0 : i32, i32, i32
  }
  func.func @transform_8(%arg0: i32, %arg1: i32) -> (i32, i32) {
    %c0_i32 = arith.constant 0 : i32
    %c0_i32_0 = arith.constant 0 : i32
    return %arg0, %c0_i32 : i32, i32
  }
}

</mosaic_0001>

<bundles_post_ra>
// kernel: tpu_custom_call.1
= control target key start
LH: loop header
LB: loop body
LE: loop exit
PB: predicated region body
PF: predicated region fallthrough
CT: control target
= control target key end

     0   :  { %s3398_s0 = inlined_call_operand.hbm [shape: f32[16,128], index: 0, kind: input, shape index: {}]   ;;  %s3399_s1 = inlined_call_operand.vmem [shape: f32[2,1,8], index: 1, kind: input, shape index: {}]   ;;  %s3400_s2 = inlined_call_operand.vmem [shape: f32[1,256], index: 2, kind: input, shape index: {}]   ;;  %s3401_s3 = inlined_call_operand.hbm [shape: bf16[2,128,384], index: 3, kind: input, shape index: {}]   ;;  %s3402_s4 = inlined_call_operand.hbm [shape: bf16[2,128,128], index: 4, kind: input, shape index: {}]   ;;  %s3403_s5 = inlined_call_operand.hbm [shape: bf16[2,128,256], index: 5, kind: input, shape index: {}]   ;;  %s3404_s6 = inlined_call_operand.hbm [shape: bf16[2,256,128], index: 6, kind: input, shape index: {}]   ;;  %s3405_s7 = inlined_call_operand.vmem [shape: f32[2,1,1408], index: 7, kind: input, shape index: {}]   ;;  %s3406_s8 = inlined_call_operand.hbm [shape: f32[16,128], index: 8, kind: output, shape index: {}]  }
   0x1   :  { %3423 = sst [smem:[#allocation21_spill]] %s3401_s3 }
   0x2   :  { %3424 = sst [smem:[#allocation22_spill]] %s3403_s5 }
   0x3   :  { %3425 = sst [smem:[#allocation23_spill]] %s3406_s8 }
   0x4   :  { %13 = vsyncpa [#allocation3], 0 }
   0x5   :  { %14 = vsyncpa [#allocation6], 0 }
   0x6   :  { %16 = vsyncpa [#allocation6 + $0x1], 0 }
   0x7   :  { %17 = vsyncpa [#allocation9], 0 }
   0x8   :  { %19 = vsyncpa [#allocation9 + $0x1], 0 }
   0x9   :  { %20 = vsyncpa [#allocation4], 0  ;;  %s2855_s27 = smov 0   ;;  %s2857_s28 = smov 0  }
   0xa   :  { %s2859_s29 = smov 0   ;;  %s2861_s30 = smov 0  }
   0xb   :  { %s2863_s9 = smov 0   ;;  %s2865_s10 = smov 0  }
   0xc LB: > { %3426 = sst [smem:[#allocation16_spill]] %s2778_s29  ;;  %s35_s11 = sadd.s32 1, %s2786_s9  ;;  %s2790_s10 = sphi %s2865_s10, %s26_s10   ;;  %s2786_s9 = sphi %s2863_s9, %s3453_s9   ;;  %s2782_s30 = sphi %s2861_s30, %s3452_s30   ;;  %s2778_s29 = sphi %s2859_s29, %s3456_s29   ;;  %s2774_s28 = sphi %s2857_s28, %s3455_s28   ;;  %s2770_s27 = sphi %s2855_s27, %s3454_s27  }
   0xd   : > { %3427 = sst [smem:[#allocation17_spill]] %s2786_s9  ;;  %s118_s12 = sadd.s32 1, %s2778_s29 }
   0xe   : > { %3428 = sst [smem:[#allocation18_spill]] %s2790_s10  ;;  %p36_p0 = scmp.ge.s32.totalorder %s35_s11, 2 }
   0xf   : > { %p125_p1 = scmp.ne.s32.totalorder %s2778_s29, %s2774_s28  ;;  %p126_p2 = scmp.eq.s32.totalorder %s2790_s10, 0 }
  0x10   : > { %s3458_s11 = smov (%p36_p0, %s35_s11), 0  ;;  %p2372_p4 = scmp.lt.s32.totalorder %s2790_s10, 2 }
  0x11   : > { %3429 = sst [smem:[#allocation19_spill]] %s3458_s11  ;;  %p127_p3 = por %p126_p2, %p125_p1 }
  0x12   : > { %s115_s13 = ssub.s32 %s2786_s9, %s3458_s11  ;;  %s3407_s14 = sand.u32 1, %s2790_s10  }
  0x13   : > { %p116_p5 = scmp.eq.s32.totalorder %s115_s13, 0  ;;  %s2897_s15 = sand.u32 1, %s2778_s29  }
  0x14   : > { %s2335_s16 = smul.u32 3072, %s2786_s9  ;;  %s3431_s3 = sld [smem:[#allocation21_spill]] }
  0x15   : > { %s2901_s17 = scalar_select %p116_p5, %s2778_s29, %s118_s12  }
  0x16   : > { %s2334_s18 = smul.u32 192, %s2897_s15  ;;  %p2909_p6 = pnand %p2372_p4, %p127_p3 }
  0x17   : > { %3430 = sst [smem:[#allocation20_spill]] %s2901_s17  ;;  %s2917_s25 = scalar_lea.sflag [#allocation6], %s3407_s14 }
  0x18   : > { %s3432_s22 = scalar_select %p2909_p6, 1, 0 }
  0x19   : > { %s316_s23 = scalar_lea.vmem [#allocation5], %s2334_s18  ;;  %p2923_p8 = pneg %p2909_p6 }
  0x1a   : > { %s2907_s21 = scalar_lea.hbm %s3431_s3, %s2335_s16  ;;  %s323_s24 = sshll.u32 %s316_s23, 4  ;;  %s2913_s24 = int_to_ptr.vmem [resolvable:$true] %s323_s24 }
  0x1b   : > { %s2554_s26 = scalar_lea.hbm %s2907_s21, 3072  ;;  %s2559_s18 = scalar_lea.hbm %s3431_s3, 6144 }
  0x1c   : > { %p2555_p7 = scmp.ne.s32.totalorder %s2907_s21, %s2554_s26  ;;  %p2560_p11 = scmp.lt.u32.totalorder %s2907_s21, %s3431_s3 }
  0x1d   : > { %s3433_s12 = scalar_select %p2923_p8, 1, 0 }
  0x1e   : > { %p2557_p9 = pnand %p2923_p8, %p2555_p7  ;;  %p2561_p12 = scmp.lt.u32.totalorder %s2559_s18, %s2554_s26 }
  0x1f   : > { %p2563_p0 = scmp.lt.u32.totalorder %s2554_s26, %s2907_s21 }
  0x20   : > { %p2558_p10 = pneg %p2557_p9  ;;  %p2562_p13 = por %p2561_p12, %p2560_p11 }
  0x22   : > { %p2564_p1 = por %p2563_p0, %p2562_p13 }
  0x24   : > { %p2565_p2 = pnand %p2564_p1, %p2558_p10 }
  0x26   : > { %2568 = shalt.err (!%p2565_p2)
}
  0x27   : > { %s2569_s23 = scalar_lea.vmem %s2913_s24, 3072  ;;  %s2792_s13 = smov [#allocation5]  }
  0x28   : > { %p2570_p3 = scmp.ne.s32.totalorder %s2913_s24, %s2569_s23  ;;  %s2574_s16 = sshll.u32 %s2792_s13, 4  ;;  %s2575_s16 = int_to_ptr.vmem [resolvable:$false] %s2574_s16 }
  0x29   : > { %s2576_s19 = scalar_lea.vmem %s2575_s16, 6144  ;;  %p2577_p7 = scmp.lt.s32.totalorder %s2913_s24, %s2575_s16 }
  0x2a   : > { %p2572_p4 = pnand %p2570_p3, %p2923_p8  ;;  %p2578_p9 = scmp.lt.s32.totalorder %s2576_s19, %s2569_s23 }
  0x2c   : > { %p2573_p5 = pneg %p2572_p4  ;;  %p2579_p11 = por %p2578_p9, %p2577_p7 }
  0x2e   : > { %p2580_p12 = pnand %p2579_p11, %p2573_p5 }
  0x30   : > { %2583 = shalt.err (!%p2580_p12)
}
  0x31   : > { %s2793_s26 = smov 192   ;;  %s2794_s18 = smov 12  }
  0x32   : > { %2361 = dma.hbm_to_vmem [thread:$0]  (!%p2909_p6), %s2907_s21, 3072, %s2913_s24, %s2917_s25, %s2793_s26, %s2793_s26, %s2794_s18  }
  0x33   : > { %s3409_s20 = sshll.u32 %s2897_s15, 7  ;;  %s2183_s13 = sshll.u32 %s2786_s9, 11 }
  0x34   : > { %s3434_s5 = sld [smem:[#allocation22_spill]]  ;;  %s358_s14 = scalar_lea.vmem [#allocation8], %s3409_s20 }
  0x35   : > { %s365_s3 = sshll.u32 %s358_s14, 4  ;;  %s2961_s21 = scalar_lea.hbm %s3404_s6, %s2183_s13  ;;  %s2956_s3 = int_to_ptr.vmem [resolvable:$true] %s365_s3 }
  0x36   : > { %s3435_s24 = sand.u32 1, %s2790_s10  }
  0x37   : > { %s2965_s26 = scalar_lea.sflag [#allocation9], %s3435_s24 }
  0x3a   : > { %s2952_s19 = scalar_lea.hbm %s3434_s5, %s2183_s13  ;;  %s2589_s20 = scalar_lea.hbm %s3434_s5, 4096 }
  0x3b   : > { %s2584_s18 = scalar_lea.hbm %s2952_s19, 2048  ;;  %p2590_p1 = scmp.lt.u32.totalorder %s2952_s19, %s3434_s5 }
  0x3c   : > { %p2585_p10 = scmp.ne.s32.totalorder %s2952_s19, %s2584_s18  ;;  %p2591_p2 = scmp.lt.u32.totalorder %s2589_s20, %s2584_s18 }
  0x3d   : > { %p2593_p4 = scmp.lt.u32.totalorder %s2584_s18, %s2952_s19 }
  0x3e   : > { %p2587_p13 = pnand %p2585_p10, %p2923_p8  ;;  %p2592_p3 = por %p2591_p2, %p2590_p1 }
  0x40   : > { %p2588_p0 = pneg %p2587_p13  ;;  %p2594_p5 = por %p2593_p4, %p2592_p3 }
  0x42   : > { %p2595_p7 = pnand %p2594_p5, %p2588_p0 }
  0x44   : > { %2598 = shalt.err (!%p2595_p7)
}
  0x45   : > { %s2599_s11 = scalar_lea.vmem %s2956_s3, 2048  ;;  %s2795_s17 = smov [#allocation8]  }
  0x46   : > { %p2600_p9 = scmp.ne.s32.totalorder %s2956_s3, %s2599_s11  ;;  %s2604_s13 = sshll.u32 %s2795_s17, 4  ;;  %s2605_s13 = int_to_ptr.vmem [resolvable:$false] %s2604_s13 }
  0x47   : > { %s2606_s29 = scalar_lea.vmem %s2605_s13, 4096  ;;  %p2607_p10 = scmp.lt.s32.totalorder %s2956_s3, %s2605_s13 }
  0x48   : > { %p2602_p11 = pnand %p2600_p9, %p2923_p8  ;;  %p2608_p13 = scmp.lt.s32.totalorder %s2606_s29, %s2599_s11 }
  0x4a   : > { %p2603_p12 = pneg %p2602_p11  ;;  %p2609_p1 = por %p2608_p13, %p2607_p10 }
  0x4c   : > { %p2610_p2 = pnand %p2609_p1, %p2603_p12 }
  0x4e   : > { %2613 = shalt.err (!%p2610_p2)
}
  0x4f   : > { %s3411_s20 = smov 128   ;;  %s3412_s24 = smov 8  }
  0x50   : > { %2367 = dma.hbm_to_vmem [thread:$0]  (!%p2909_p6), %s2952_s19, 2048, %s2956_s3, %s2965_s26, %s3411_s20, %s3411_s20, %s3412_s24  }
  0x51   : > { %s3436_s18 = sshll.u32 %s2897_s15, 7  ;;  %s2997_s14 = sadd.s32 4294967295, %s2790_s10  }
  0x52   : > { %s379_s16 = scalar_lea.vmem [#allocation10], %s3436_s18  ;;  %p131_p0 = scmp.ne.s32.totalorder %s2774_s28, %s2770_s27 }
  0x53   : > { %s386_s23 = sshll.u32 %s379_s16, 4  ;;  %p3416_p3 = scmp.eq.s32.totalorder %s2997_s14, 0  ;;  %s2994_s23 = int_to_ptr.vmem [resolvable:$true] %s386_s23 }
  0x54   : > { %p2074_p4 = scmp.ge.s32.totalorder %s2790_s10, 1  ;;  %p272_p5 = scmp.lt.s32.totalorder %s2790_s10, 3 }
  0x55   : > { %p3006_p7 = por %p3416_p3, %p131_p0  ;;  %s2798_s19 = smov [#allocation2]  }
  0x56   : > { %p3010_p9 = pnand %p2074_p4, %p272_p5  ;;  %s287_s17 = sshll.u32 %s2798_s19, 4  ;;  %s3014_s17 = int_to_ptr.vmem [resolvable:$true] %s287_s17 }
  0x57   : > { %s3437_s11 = scalar_select %p3006_p7, 1, 0 }
  0x58   : > { %s3438_s3 = scalar_select %p3010_p9, 1, 0 }
  0x59   : > { %s2079_s13 = sshll.u32 %s2897_s15, 6  ;;  %p2354_p11 = pneg %p3010_p9 }
  0x5a   : > { %s2182_s27 = sshll.u32 %s2786_s9, 10  ;;  %s337_s29 = scalar_lea.vmem [#allocation7], %s2079_s13 }
  0x5b   : > { %s344_s18 = sshll.u32 %s337_s29, 4  ;;  %p3022_p12 = pnand %p2354_p11, %p3416_p3  ;;  %s3031_s18 = int_to_ptr.vmem [resolvable:$true] %s344_s18 }
  0x5c   : > { %s3029_s5 = scalar_lea.hbm %s3402_s4, %s2182_s27  ;;  %s2614_s10 = scalar_lea.hbm %s3398_s0, 256 }
  0x5d   : > { %p2615_p10 = scmp.ne.s32.totalorder %s3398_s0, %s2614_s10  ;;  %p2616_p13 = pneg %p3022_p12 }
  0x5e   : > { %p2621_p0 = scmp.lt.u32.totalorder %s2614_s10, %s3398_s0 }
  0x5f   : > { %p2617_p1 = pnand %p2616_p13, %p2615_p10 }
  0x61   : > { %p2618_p2 = pneg %p2617_p1 }
  0x63   : > { %p2623_p4 = pnand %p2621_p0, %p2618_p2 }
  0x65   : > { %2626 = shalt.err (!%p2623_p4)
}
  0x66   : > { %s2627_s20 = scalar_lea.vmem %s3014_s17, 256  ;;  %p2635_p7 = scmp.lt.s32.totalorder %s3014_s17, %s3014_s17 }
  0x67   : > { %p2628_p5 = scmp.ne.s32.totalorder %s3014_s17, %s2627_s20  ;;  %p2636_p9 = scmp.lt.s32.totalorder %s2627_s20, %s2627_s20 }
  0x69   : > { %p2630_p11 = pnand %p2628_p5, %p2616_p13  ;;  %p2637_p6 = por %p2636_p9, %p2635_p7 }
  0x6b   : > { %p2631_p3 = pneg %p2630_p11 }
  0x6d   : > { %p2638_p8 = pnand %p2637_p6, %p2631_p3 }
  0x6f   : > { %2641 = shalt.err (!%p2638_p8)
}
  0x70   : > { %s3440_s9 = smov 8   ;;  %s3441_s8 = smov 128  }
  0x71   : > { %2357 = dma.hbm_to_vmem [thread:$0]  (!%p3022_p12), %s3398_s0, 256, %s3014_s17, [#allocation3], %s3441_s8, %s3441_s8, %s3440_s9  }
  0x72   : > { %s2642_s27 = scalar_lea.hbm %s3029_s5, 1024  ;;  %p3442_p7 = scmp.ne.s32.totalorder %s3433_s12, 0 }
  0x73   : > { %p2643_p10 = scmp.ne.s32.totalorder %s3029_s5, %s2642_s27  ;;  %s2647_s15 = scalar_lea.hbm %s3402_s4, 2048 }
  0x74   : > { %p2648_p3 = scmp.lt.u32.totalorder %s3029_s5, %s3402_s4  ;;  %p2649_p9 = scmp.lt.u32.totalorder %s2647_s15, %s2642_s27 }
  0x75   : > { %p2645_p6 = pnand %p2643_p10, %p3442_p7  ;;  %p2651_p1 = scmp.lt.u32.totalorder %s2642_s27, %s3029_s5 }
  0x76   : > { %p2650_p13 = por %p2649_p9, %p2648_p3 }
  0x77   : > { %p2646_p8 = pneg %p2645_p6 }
  0x78   : > { %p2652_p2 = por %p2651_p1, %p2650_p13 }
  0x7a   : > { %p2653_p0 = pnand %p2652_p2, %p2646_p8 }
  0x7c   : > { %2656 = shalt.err (!%p2653_p0)
}
  0x7d   : > { %s2657_s17 = scalar_lea.vmem %s3031_s18, 1024  ;;  %s2799_s20 = smov [#allocation7]  }
  0x7e   : > { %p2658_p12 = scmp.ne.s32.totalorder %s3031_s18, %s2657_s17  ;;  %s2662_s9 = sshll.u32 %s2799_s20, 4  ;;  %s2663_s9 = int_to_ptr.vmem [resolvable:$false] %s2662_s9 }
  0x7f   : > { %s2664_s8 = scalar_lea.vmem %s2663_s9, 2048  ;;  %p2665_p11 = scmp.lt.s32.totalorder %s3031_s18, %s2663_s9 }
  0x80   : > { %p2660_p4 = pnand %p2658_p12, %p3442_p7  ;;  %p2666_p10 = scmp.lt.s32.totalorder %s2664_s8, %s2657_s17 }
  0x82   : > { %p2661_p5 = pneg %p2660_p4  ;;  %p2667_p6 = por %p2666_p10, %p2665_p11 }
  0x84   : > { %p2668_p3 = pnand %p2667_p6, %p2661_p5 }
  0x86   : > { %2671 = shalt.err (!%p2668_p3)
}
  0x87   : > { %s2800_s10 = smov 64   ;;  %s2801_s24 = smov 4  }
  0x88   : > { %p3443_p8 = scmp.ne.s32.totalorder %s3432_s22, 0  ;;  %s2672_s27 = scalar_lea.hbm %s2961_s21, 2048 }
  0x89   : > { %p2673_p9 = scmp.ne.s32.totalorder %s2961_s21, %s2672_s27  ;;  %s2677_s15 = scalar_lea.hbm %s3404_s6, 4096 }
  0x8a   : > { %2364 = dma.hbm_to_vmem [thread:$0]  (!%p3443_p8), %s3029_s5, 1024, %s3031_s18, %s2917_s25, %s2800_s10, %s2800_s10, %s2801_s24  }
  0x8b   : > { %p2675_p13 = pnand %p2673_p9, %p3442_p7  ;;  %p2678_p2 = scmp.lt.u32.totalorder %s2961_s21, %s3404_s6 }
  0x8c   : > { %p2679_p0 = scmp.lt.u32.totalorder %s2677_s15, %s2672_s27  ;;  %p2681_p4 = scmp.lt.u32.totalorder %s2672_s27, %s2961_s21 }
  0x8d   : > { %p2676_p1 = pneg %p2675_p13 }
  0x8e   : > { %p2680_p12 = por %p2679_p0, %p2678_p2 }
  0x90   : > { %p2682_p5 = por %p2681_p4, %p2680_p12 }
  0x92   : > { %p2683_p11 = pnand %p2682_p5, %p2676_p1 }
  0x94   : > { %2686 = shalt.err (!%p2683_p11)
}
  0x95   : > { %s2687_s5 = scalar_lea.vmem %s2994_s23, 2048  ;;  %s2802_s25 = smov [#allocation10]  }
  0x96   : > { %p2688_p10 = scmp.ne.s32.totalorder %s2994_s23, %s2687_s5  ;;  %s2692_s18 = sshll.u32 %s2802_s25, 4  ;;  %s2693_s18 = int_to_ptr.vmem [resolvable:$false] %s2692_s18 }
  0x97   : > { %s2694_s17 = scalar_lea.vmem %s2693_s18, 4096  ;;  %p2695_p9 = scmp.lt.s32.totalorder %s2994_s23, %s2693_s18 }
  0x98   : > { %p2690_p6 = pnand %p2688_p10, %p3442_p7  ;;  %p2696_p13 = scmp.lt.s32.totalorder %s2694_s17, %s2687_s5 }
  0x9a   : > { %p2691_p3 = pneg %p2690_p6  ;;  %p2697_p2 = por %p2696_p13, %p2695_p9 }
  0x9c   : > { %p2698_p0 = pnand %p2697_p2, %p2691_p3 }
  0x9e   : > { %2701 = shalt.err (!%p2698_p0)
}
  0x9f   : > { %2370 = dma.hbm_to_vmem [thread:$0]  (!%p3443_p8), %s2961_s21, 2048, %s2994_s23, %s2965_s26, %s2800_s10, %s2800_s10, %s2801_s24  }
  0xa0   : > { %p3444_p7 = scmp.ne.s32.totalorder %s3438_s3, 0 }
  0xa1   : > { %p3445_p1 = scmp.eq.s32.totalorder (!%p3444_p7), %s2997_s14, 0 }
  0xa2   : > { %405 = sbr.rel (%p3444_p7) target bundleno = 3380 (0xd34), region = 52 }
  0xa9   : > { %2753 = dma.done.wait (%p3445_p1), [#allocation3], 256   ;;  %p3446_p12 = pmov %p3445_p1 }
  0xaa   : > { %s411_s22 = sand.u32 1, %s2997_s14   ;;  %s413_s12 = sand.u32 1, %s2774_s28  }
  0xab   : > { %2755 = vsyncadd (%p3446_p12), [#allocation3], 4294967040  ;;  %s2336_s20 = smul.u32 192, %s413_s12  ;;  %s412_s9 = scalar_lea.sflag [#allocation6], %s411_s22 }
  0xac   : > { %p3447_p4 = scmp.ne.s32.totalorder %s3437_s11, 0 }
  0xad   : > { %s3115_s8 = scalar_lea.vmem [#allocation5], %s2336_s20 }
  0xae   : > { %2757 = dma.done.wait (%p3447_p4), %s412_s9, 4096  }
  0xaf   : > { %2759 = vsyncadd (%p3447_p4), %s412_s9, 4294963200  ;;  %s2090_s21 = sshll.u32 %s413_s12, 6  ;;  %s2091_s26 = sshll.u32 %s413_s12, 7 }
  0xb0   : > { %s3121_s23 = scalar_lea.vmem [#allocation7], %s2090_s21  ;;  %s430_s3 = scalar_lea.sflag [#allocation9], %s411_s22 }
  0xb1   : > { %s3123_s10 = scalar_lea.vmem [#allocation8], %s2091_s26 }
  0xb2   : > { %2761 = dma.done.wait (%p3447_p4), %s430_s3, 4096  }
  0xb3   : > { %2763 = vsyncadd (%p3447_p4), %s430_s3, 4294963200  ;;  %p499_p8 = scmp.lt.s32.totalorder %s2782_s30, 1  ;;  %s3136_s13 = scalar_lea.vmem [#allocation10], %s2091_s26 }
  0xb4   : > { %p2093_p5 = scmp.ne.s32.totalorder %s2782_s30, 0 }
  0xb5   : > { %s500_s24 = scalar_select %p499_p8, %s2782_s30, 1 }
  0xb6   : > { %508 = sbr.rel (%p2093_p5) target bundleno = 499 (0x1f3), region = 76  ;;  %v509_v0 = vld [vmem:[#allocation2] sm:$0xff] (!%p2093_p5)  ;;  %v510_v1 = vld [vmem:[#allocation2 + $0x8] sm:$0xff] (!%p2093_p5) }
  0xb7   : > { %s2337_s27 = smul.u32 11, %s500_s24  ;;  %513 = vadd.xlane.f32.xlu0 (!%p2093_p5), %v509_v0  ;;  %v2094_v17 = vld [vmem:[%s3400_s2] ss:$0 sm:$0xff] (!%p2093_p5)  ;;  %v2095_v19 = vld [vmem:[%s3400_s2 + $0x1] ss:$0 sm:$0xff] (!%p2093_p5) }
  0xb9   : > { %s3134_s15 = scalar_lea.vmem %s3405_s7, %s2337_s27 }
  0xbb   : > { %515 = vadd.xlane.f32.xlu0 (!%p2093_p5), %v510_v1 }
 0x144   : > { %v514_v2 = vpop.xlane.xlu0 %513 }
 0x145   : > { %v518_v3 = vmul.f32 0.0078125, %v514_v2 }
 0x147   : > { %v520_v4 = vsub.f32 %v509_v0, %v518_v3 }
 0x148   : > { %v516_v5 = vpop.xlane.xlu0 %515 }
 0x149   : > { %v519_v6 = vmul.f32 0.0078125, %v516_v5  ;;  %v522_v7 = vmul.f32 %v520_v4, %v520_v4 }
 0x14b   : > { %v521_v8 = vsub.f32 %v510_v1, %v519_v6  ;;  %524 = vadd.xlane.f32.xlu1 %v522_v7 }
 0x14d   : > { %v523_v9 = vmul.f32 %v521_v8, %v521_v8 }
 0x14f   : > { %526 = vadd.xlane.f32.xlu1 %v523_v9 }
 0x1d8   : > { %v525_v10 = vpop.xlane.xlu1 %524 }
 0x1d9   : > { %v528_v11 = vmul.f32 0.0078125, %v525_v10 }
 0x1db   : > { %v530_v12 = vadd.f32 1e-12, %v528_v11 }
 0x1dc   : > { %v527_v13 = vpop.xlane.xlu1 %526 }
 0x1dd   : > { %2438 = vrsqrt.f32 %v530_v12  ;;  %v529_v14 = vmul.f32 0.0078125, %v527_v13 }
 0x1df   : > { %v531_v15 = vadd.f32 1e-12, %v529_v14 }
 0x1e1   : > { %2440 = vrsqrt.f32 %v531_v15 }
 0x1e7   : > { %v2439_v16 = vpop.eup %2438 }
 0x1e8   : > { %v534_v18 = vmul.f32 %v2439_v16, %v520_v4 }
 0x1ea   : > { %v542_v20 = vmul.f32 %v2094_v17, %v534_v18 }
 0x1eb   : > { %v2441_v21 = vpop.eup %2440 }
 0x1ec   : > { %v550_v22 = vadd.f32 %v2095_v19, %v542_v20  ;;  %v535_v23 = vmul.f32 %v2441_v21, %v521_v8 }
 0x1ee   : > { %552 = vst [vmem:[#allocation11] sm:$0xff] %v550_v22  ;;  %v543_v24 = vmul.f32 %v2094_v17, %v535_v23 }
 0x1f0   : > { %v551_v25 = vadd.f32 %v2095_v19, %v543_v24 }
 0x1f2   : > { %553 = vst [vmem:[#allocation11 + $0x8] sm:$0xff] %v551_v25 }
 0x1f3 PF: > { %v2442_v26 = vld [vmem:[%s3115_s8 + $0x4] ss:$12 sps:$4 sm:$0xff]   ;;  %v2444_v27 = vld [vmem:[%s3115_s8] ss:$12 sps:$4 sm:$0xff]   ;;  %v2803_v28 = vmov 0   ;;  %v2804_v29 = vmov 0.0   ;;  %v600_v55 = vlaneseq }
 0x1f4   : > { %775 = vmatprep.mubr.bf16.mxu0 %v2803_v28  ;;  %2242 = vmatprep.subr.bf16.mxu1 %v2804_v29  ;;  %v2445_v30 = vld [vmem:[%s3115_s8 + $0x1c] ss:$12 sps:$4 sm:$0xff]   ;;  %v2447_v31 = vld [vmem:[%s3115_s8 + $0x18] ss:$12 sps:$4 sm:$0xff]   ;;  %v2448_v32 = vld [vmem:[%s3115_s8 + $0x34] ss:$12 sps:$4 sm:$0xff]  }
 0x1f5   : > { %743 = vmatprep.subr.bf16.mxu0 %v2442_v26  ;;  %v2450_v33 = vld [vmem:[%s3115_s8 + $0x30] ss:$12 sps:$4 sm:$0xff]   ;;  %v2451_v34 = vld [vmem:[%s3115_s8 + $0x4c] ss:$12 sps:$4 sm:$0xff]   ;;  %v2453_v35 = vld [vmem:[%s3115_s8 + $0x48] ss:$12 sps:$4 sm:$0xff]  }
 0x1f6   : > { %744 = vmatpush1.bf16.msra.mxu0 %v2444_v27  ;;  %v2454_v36 = vld [vmem:[%s3115_s8 + $0x64] ss:$12 sps:$4 sm:$0xff]   ;;  %v2466_v37 = vld [vmem:[%s3115_s8 + $0x8] ss:$12 sps:$4 sm:$0xff]   ;;  %v2467_v38 = vld [vmem:[%s3115_s8 + $0x20] ss:$12 sps:$4 sm:$0xff]  }
 0x1f7   : > { %745 = vmatprep.subr.bf16.mxu0 %v2445_v30  ;;  %2243 = vmatpush3.bf16.msra.mxu1 %v2466_v37  ;;  %v2456_v39 = vld [vmem:[%s3115_s8 + $0x60] ss:$12 sps:$4 sm:$0xff]   ;;  %v2457_v40 = vld [vmem:[%s3115_s8 + $0x7c] ss:$12 sps:$4 sm:$0xff]   ;;  %v2459_v41 = vld [vmem:[%s3115_s8 + $0x78] ss:$12 sps:$4 sm:$0xff]  }
 0x1f8   : > { %2244 = vmatprep.subr.bf16.mxu1 %v2804_v29  ;;  %v2460_v42 = vld [vmem:[%s3115_s8 + $0x94] ss:$12 sps:$4 sm:$0xff]   ;;  %v2468_v43 = vld [vmem:[%s3115_s8 + $0x38] ss:$12 sps:$4 sm:$0xff]   ;;  %v2469_v44 = vld [vmem:[%s3115_s8 + $0x50] ss:$12 sps:$4 sm:$0xff]  }
 0x1f9   : > { %v2462_v45 = vld [vmem:[%s3115_s8 + $0x90] ss:$12 sps:$4 sm:$0xff]   ;;  %v2463_v46 = vld [vmem:[%s3115_s8 + $0xac] ss:$12 sps:$4 sm:$0xff]   ;;  %v2470_v47 = vld [vmem:[%s3115_s8 + $0x68] ss:$12 sps:$4 sm:$0xff]  }
 0x1fa   : > { %746 = vmatpush1.bf16.msra.mxu0 %v2447_v31  ;;  %v2465_v48 = vld [vmem:[%s3115_s8 + $0xa8] ss:$12 sps:$4 sm:$0xff]   ;;  %v3171_v49 = vld [vmem:[#allocation11] sm:$0xff]  ;;  %v2473_v54 = vld [vmem:[%s3115_s8 + $0xb0] ss:$12 sps:$4 sm:$0xff]   ;;  %vm2805_vm0 = vmmov 0  }
 0x1fb   : > { %747 = vmatprep.subr.bf16.mxu0 %v2448_v32  ;;  %2245 = vmatpush3.bf16.msra.mxu1 %v2467_v38  ;;  %v3173_v50 = vld [vmem:[#allocation11 + $0x8] sm:$0xff]  ;;  %v2472_v53 = vld [vmem:[%s3115_s8 + $0x98] ss:$12 sps:$4 sm:$0xff]   ;;  %v3192_v56 = vshrl.u32 %v600_v55, 7  ;;  %vm833_vm1 = vcmask 523264   ;;  %s2806_s25 = smov 64  }
 0x1fc   : > { %2246 = vmatprep.subr.bf16.mxu1 %v2804_v29  ;;  %v2471_v51 = vld [vmem:[%s3115_s8 + $0x80] ss:$12 sps:$4 sm:$0xff]   ;;  %v566_v52 = vpack.c.bf16 %v3173_v50, %v3171_v49  ;;  %2258 = vmatprep.mubr.msk.bf16.mxu1 %vm2805_vm0, %v2804_v29  ;;  %v558_v58 = vld [vmem:[%s3134_s15] sm:$0x7]  ;;  %vm970_vm2 = vcmask 1043456   ;;  %vm942_vm3 = vcmask 64512  }
 0x1fd   : > { %v606_v57 = vsub.s32 1, %v3192_v56  ;;  %v602_v60 = vsub.s32 0, %v3192_v56  ;;  %v610_v12 = vsub.s32 2, %v3192_v56  ;;  %v3226_v25 = vld [vmem:[%s3399_s1] ss:$0 sm:$0xff]  ;;  %s2807_s20 = smov [#allocation11]  }
 0x1fe   : > { %748 = vmatpush1.bf16.msra.mxu0 %v2450_v33  ;;  %v3231_v32 = vld [vmem:[%s3399_s1 + $0x1] ss:$0 sm:$0xff]  ;;  %s1908_s9 = sshll.u32 %s2807_s20, 4  ;;  %p2374_p11 = scmp.eq.s32.totalorder %s2997_s14, 1  ;;  %s1909_s9 = int_to_ptr.vmem [resolvable:$true] %s1908_s9 }
 0x1ff   : > { %749 = vmatprep.subr.bf16.mxu0 %v2451_v34  ;;  %2247 = vmatpush3.bf16.msra.mxu1 %v2468_v43  ;;  %v607_v59 = vrot.slane %v558_v58, %v606_v57  ;;  %v603_v2 = vrot.slane %v558_v58, %v602_v60  ;;  %v611_v13 = vrot.slane %v558_v58, %v610_v12  ;;  %s2702_s8 = scalar_lea.vmem %s1909_s9, 256  ;;  %p2709_p9 = scmp.lt.s32.totalorder %s1909_s9, %s1909_s9 }
 0x200   : > { %2248 = vmatprep.subr.bf16.mxu1 %v2804_v29  ;;  %p2703_p10 = scmp.ne.s32.totalorder %s1909_s9, %s2702_s8  ;;  %p2710_p13 = scmp.lt.s32.totalorder %s2702_s8, %s2702_s8 }
 0x202   : > { %750 = vmatpush1.bf16.msra.mxu0 %v2453_v35  ;;  %p2704_p6 = pnand %p2703_p10, %p2374_p11  ;;  %p2711_p2 = por %p2710_p13, %p2709_p9 }
 0x203   : > { %751 = vmatprep.subr.bf16.mxu0 %v2454_v36  ;;  %2249 = vmatpush3.bf16.msra.mxu1 %v2469_v44 }
 0x204   : > { %2250 = vmatprep.subr.bf16.mxu1 %v2804_v29  ;;  %p2705_p3 = pneg %p2704_p6 }
 0x206   : > { %752 = vmatpush1.bf16.msra.mxu0 %v2456_v39  ;;  %p2712_p0 = pnand %p2711_p2, %p2705_p3 }
 0x207   : > { %753 = vmatprep.subr.bf16.mxu0 %v2457_v40  ;;  %2251 = vmatpush3.bf16.msra.mxu1 %v2470_v47 }
 0x208   : > { %2252 = vmatprep.subr.bf16.mxu1 %v2804_v29 }
 0x20a   : > { %754 = vmatpush1.bf16.msra.mxu0 %v2459_v41 }
 0x20b   : > { %755 = vmatprep.subr.bf16.mxu0 %v2460_v42  ;;  %2253 = vmatpush3.bf16.msra.mxu1 %v2471_v51 }
 0x20c   : > { %2254 = vmatprep.subr.bf16.mxu1 %v2804_v29 }
 0x20e   : > { %756 = vmatpush1.bf16.msra.mxu0 %v2462_v45 }
 0x20f   : > { %757 = vmatprep.subr.bf16.mxu0 %v2463_v46  ;;  %2255 = vmatpush3.bf16.msra.mxu1 %v2472_v53 }
 0x210   : > { %2256 = vmatprep.subr.bf16.mxu1 %v2804_v29 }
 0x212   : > { %758 = vmatpush1.bf16.msra.mxu0 %v2465_v48 }
 0x213   : > { %2262 = vmatprep.subr.bf16.mxu0 %v2804_v29  ;;  %2257 = vmatpush3.bf16.msra.mxu1 %v2473_v54 }
 0x214   : > { %2268 = vmatprep.subr.bf16.mxu1 %v2804_v29 }
 0x215   : > { %776 = vmatmul.mubr.bf16.vlgmr.msra.gmra.mrb[0].mxu0 %v566_v52 }
 0x216   : > { %2264 = vmatprep.mubr.msk.bf16.mxu0 %vm2805_vm0, %v2804_v29  ;;  %2259 = vmatmul.mubr.bf16.vlgmr.msra.gmra.mrb[0].mxu1 %v566_v52 }
 0x217   : > { %2270 = vmatprep.mubr.msk.bf16.mxu1 %vm2805_vm0, %v2804_v29 }
 0x2e8   : > { %v777_v61 = vpop.f32.mrb[0].mxu0 }
 0x2e9   : > { %v779_v62 = vpop.f32.mrb[1].mxu0  ;;  %v778_v7 = vadd.f32 %v777_v61, %v603_v2  ;;  %v820_v14 = vpop.f32.mrb[0].mxu1 }
 0x2ea   : > { %v780_v63 = vadd.f32 %v779_v62, %v607_v59  ;;  %v781_v0 = vpop.f32.mrb[2].mxu0  ;;  %v821_v15 = vadd.f32 %v820_v14, %v611_v13  ;;  %v2260_v16 = vpop.f32.mrb[1].mxu1 }
 0x2eb   : > { %v783_v1 = vpop.f32.mrb[3].mxu0  ;;  %v782_v9 = vadd.f32 %v781_v0, %v603_v2  ;;  %v827_v10 = vpack.c.bf16 %v778_v7, %v778_v7  ;;  %v823_v17 = vpop.f32.mrb[2].mxu1 }
 0x2ec   : > { %v829_v3 = vpack.c.bf16 %v780_v63, %v780_v63  ;;  %v784_v4 = vadd.f32 %v783_v1, %v607_v59  ;;  %v3213_v18 = vpack.c.bf16 %v821_v15, %v821_v15  ;;  %v824_v19 = vadd.f32 %v823_v17, %v611_v13  ;;  %v2261_v20 = vpop.f32.mrb[3].mxu1 }
 0x2ed   : > { %v828_v11 = vpack.c.bf16 %v782_v9, %v782_v9 }
 0x2ee   : > { %v838_v5 = vsel %vm833_vm1, %v829_v3, 0  ;;  %v830_v6 = vpack.c.bf16 %v784_v4, %v784_v4  ;;  %v972_v21 = vsel %vm970_vm2, %v3213_v18, 0  ;;  %v3217_v22 = vpack.c.bf16 %v824_v19, %v824_v19 }
 0x2ef   : > { %2263 = vmatpush3.bf16.xpose.msra.mxu0 %v838_v5 }
 0x2f0   : > { %v884_v8 = vsel %vm833_vm1, %v830_v6, 0  ;;  %1125 = vrot.lane.b32.xlu1 %v830_v6, %s2806_s25  ;;  %2274 = vmatprep.subr.bf16.mxu0 %v2804_v29  ;;  %v1018_v23 = vsel %vm970_vm2, %v3217_v22, 0 }
 0x2f1   : > { %2269 = vmatpush3.bf16.xpose.msra.mxu1 %v884_v8 }
 0x2f2   : > { %2280 = vmatprep.subr.bf16.mxu1 %v2804_v29 }
 0x2f6   : > { %2265 = vmatmul.mubr.msk.bf16.vlgmr.msra.gmra.mrb[4].mxu0 %vm833_vm1, %v827_v10 }
 0x2f7   : > { %2276 = vmatprep.mubr.msk.bf16.mxu0 %vm2805_vm0, %v2804_v29  ;;  %2275 = vmatpush3.bf16.msra.mxu0 %v972_v21 }
 0x2f8   : > { %2271 = vmatmul.mubr.msk.bf16.vlgmr.msra.gmra.mrb[4].mxu1 %vm833_vm1, %v828_v11  ;;  %2286 = vmatprep.subr.bf16.mxu0 %v2804_v29 }
 0x2f9   : > { %2282 = vmatprep.mubr.msk.bf16.mxu1 %vm2805_vm0, %v2804_v29  ;;  %2281 = vmatpush3.bf16.msra.mxu1 %v1018_v23 }
 0x2fa   : > { %2292 = vmatprep.subr.bf16.mxu1 %v2804_v29 }
 0x362   : > { %v1126_v54 = vpop.permute.xlu1 %1125 }
 0x363   : > { %v1131_v4 = vsel %vm833_vm1, %v1126_v54, 0 }
 0x3c9   : > { %v874_v24 = vpop.f32.mrb[4].mxu0 }
 0x3ca   : > { %v926_v26 = vmul.f32 0.125, %v874_v24  ;;  %v2266_v27 = vpop.f32.mrb[5].mxu0 }
 0x3cb   : > { %v877_v30 = vpop.f32.mrb[6].mxu0  ;;  %v920_v31 = vpop.f32.mrb[4].mxu1 }
 0x3cc   : > { %v927_v33 = vmul.f32 0.125, %v920_v31  ;;  %v2267_v34 = vpop.f32.mrb[7].mxu0  ;;  %v2272_v35 = vpop.f32.mrb[5].mxu1  ;;  %v940_v36 = vadd.f32 %v3226_v25, %v926_v26 }
 0x3cd   : > { %v923_v37 = vpop.f32.mrb[6].mxu1 }
 0x3ce   : > { %v2273_v38 = vpop.f32.mrb[7].mxu1  ;;  %v943_v39 = vsel %vm942_vm3, %v940_v36, -inf  ;;  %v941_v40 = vadd.f32 %v3231_v32, %v927_v33 }
 0x3cf   : > { %944 = vmax.xlane.f32.xlu0 %v943_v39 }
 0x3d0   : > { %v946_v41 = vsel %vm942_vm3, %v941_v40, -inf }
 0x3d3   : > { %947 = vmax.xlane.f32.xlu0 %v946_v41 }
 0x3e9   : > { %1073 = vrot.lane.b32.xlu0 %v829_v3, %s2806_s25 }
 0x45c   : > { %v945_v42 = vpop.xlane.xlu0 %944 }
 0x45d   : > { %v949_v43 = vsub.f32 %v940_v36, %v945_v42 }
 0x45f   : > { %v951_v44 = vmul.f32 1.442695, %v949_v43 }
 0x460   : > { %v948_v45 = vpop.xlane.xlu0 %947 }
 0x461   : > { %2522 = vpow2.f32 %v951_v44  ;;  %v950_v46 = vsub.f32 %v941_v40, %v948_v45 }
 0x463   : > { %v953_v47 = vmul.f32 1.442695, %v950_v46 }
 0x464   : > { %v1074_v62 = vpop.permute.xlu0 %1073 }
 0x465   : > { %2524 = vpow2.f32 %v953_v47  ;;  %v1079_v1 = vsel %vm833_vm1, %v1074_v62, 0  ;;  %v2475_v62 = vld [vmem:[%s3121_s23 + $0x8] sm:$0xff]  }
 0x46b   : > { %v2523_v48 = vpop.eup %2522 }
 0x46c   : > { %v955_v51 = vsel %vm942_vm3, %v2523_v48, 0.0 }
 0x46d   : > { %956 = vadd.xlane.f32.xlu1 %v955_v51 }
 0x46f   : > { %v2525_v52 = vpop.eup %2524 }
 0x470   : > { %v958_v53 = vsel %vm942_vm3, %v2525_v52, 0.0 }
 0x471   : > { %959 = vadd.xlane.f32.xlu1 %v958_v53  ;;  %v2478_v53 = vld [vmem:[%s3121_s23 + $0x20] sm:$0xff]  }
 0x482   : > { %1070 = vrot.lane.b32.xlu1 %v827_v10, %s2806_s25 }
 0x486   : > { %1122 = vrot.lane.b32.xlu1 %v828_v11, %s2806_s25 }
 0x4fa   : > { %v957_v55 = vpop.xlane.xlu1 %956 }
 0x4fb   : > { %2526 = vrcp.f32 %v957_v55 }
 0x4fe   : > { %v960_v58 = vpop.xlane.xlu1 %959 }
 0x4ff   : > { %2528 = vrcp.f32 %v960_v58 }
 0x502   : > { %v1071_v5 = vpop.permute.xlu1 %1070 }
 0x505   : > { %v2527_v59 = vpop.eup %2526 }
 0x506   : > { %v963_v61 = vmul.f32 %v2527_v59, %v2523_v48  ;;  %v1123_v6 = vpop.permute.xlu1 %1122 }
 0x508   : > { %v965_v63 = vpack.c.bf16 %v963_v61, %v963_v61  ;;  %v2479_v61 = vld [vmem:[%s3121_s23 + $0x28] sm:$0xff]  }
 0x509   : > { %v2529_v0 = vpop.eup %2528 }
 0x50a   : > { %v964_v2 = vmul.f32 %v2529_v0, %v2525_v52  ;;  %2277 = vmatmul.mubr.msk.bf16.vlgmr.msra.gmra.mrb[8].mxu0 %vm942_vm3, %v965_v63  ;;  %v2476_v63 = vld [vmem:[%s3121_s23 + $0x10] sm:$0xff]   ;;  %v2477_v0 = vld [vmem:[%s3121_s23 + $0x18] sm:$0xff]  }
 0x50b   : > { %2287 = vmatpush3.bf16.xpose.msra.mxu0 %v1079_v1  ;;  %2288 = vmatprep.mubr.msk.bf16.mxu0 %vm2805_vm0, %v2804_v29  ;;  %v2480_v1 = vld [vmem:[%s3121_s23 + $0x30] sm:$0xff]  }
 0x50c   : > { %v966_v3 = vpack.c.bf16 %v964_v2, %v964_v2  ;;  %2298 = vmatprep.subr.bf16.mxu0 %v2804_v29  ;;  %v2481_v2 = vld [vmem:[%s3121_s23 + $0x38] sm:$0xff]  }
 0x50e   : > { %2283 = vmatmul.mubr.msk.bf16.vlgmr.msra.gmra.mrb[8].mxu1 %vm942_vm3, %v966_v3 }
 0x50f   : > { %2293 = vmatpush3.bf16.xpose.msra.mxu1 %v1131_v4  ;;  %2294 = vmatprep.mubr.msk.bf16.mxu1 %vm2805_vm0, %v2804_v29 }
 0x510   : > { %2304 = vmatprep.subr.bf16.mxu1 %v2804_v29 }
 0x512   : > { %2289 = vmatmul.mubr.msk.bf16.vlgmr.msra.gmra.mrb[12].mxu0 %vm833_vm1, %v1071_v5 }
 0x513   : > { %2300 = vmatprep.mubr.msk.bf16.mxu0 %vm2805_vm0, %v2804_v29 }
 0x516   : > { %2295 = vmatmul.mubr.msk.bf16.vlgmr.msra.gmra.mrb[12].mxu1 %vm833_vm1, %v1123_v6 }
 0x517   : > { %2306 = vmatprep.mubr.msk.bf16.mxu1 %vm2805_vm0, %v2804_v29 }
 0x5dd   : > { %v3258_v7 = vpop.f32.mrb[8].mxu0 }
 0x5de   : > { %v2278_v8 = vpop.f32.mrb[9].mxu0 }
 0x5df   : > { %v1011_v9 = vpop.f32.mrb[10].mxu0 }
 0x5e0   : > { %v2279_v10 = vpop.f32.mrb[11].mxu0 }
 0x5e1   : > { %v3260_v11 = vpop.f32.mrb[8].mxu1 }
 0x5e2   : > { %v1060_v12 = vpack.c.bf16 %v3260_v11, %v3258_v7  ;;  %v2284_v13 = vpop.f32.mrb[9].mxu1 }
 0x5e3   : > { %v1057_v14 = vpop.f32.mrb[10].mxu1 }
 0x5e4   : > { %v2285_v15 = vpop.f32.mrb[11].mxu1 }
 0x5e5   : > { %v1115_v16 = vpop.f32.mrb[12].mxu0  ;;  %v2140_v15 = vld [vmem:[%s3134_s15 + $0x3] ss:$0 sm:$0xff] }
 0x5e6   : > { %v1173_v17 = vmul.f32 0.125, %v1115_v16  ;;  %v2290_v19 = vpop.f32.mrb[13].mxu0 }
 0x5e7   : > { %v1118_v20 = vpop.f32.mrb[14].mxu0 }
 0x5e8   : > { %v2291_v21 = vpop.f32.mrb[15].mxu0  ;;  %v1175_v23 = vadd.f32 %v3226_v25, %v1173_v17 }
 0x5e9   : > { %v1167_v24 = vpop.f32.mrb[12].mxu1 }
 0x5ea   : > { %v1174_v26 = vmul.f32 0.125, %v1167_v24  ;;  %v2296_v27 = vpop.f32.mrb[13].mxu1  ;;  %v1177_v30 = vsel %vm942_vm3, %v1175_v23, -inf }
 0x5eb   : > { %v1170_v31 = vpop.f32.mrb[14].mxu1  ;;  %1178 = vmax.xlane.f32.xlu0 %v1177_v30  ;;  %v2482_v30 = vld [vmem:[%s3123_s10] ss:$8 sps:$4 sm:$0xff]  }
 0x5ec   : > { %v2297_v33 = vpop.f32.mrb[15].mxu1  ;;  %v1176_v34 = vadd.f32 %v3231_v32, %v1174_v26  ;;  %v2484_v31 = vld [vmem:[%s3123_s10 + $0x4] ss:$8 sps:$4 sm:$0xff]  }
 0x5ed   : > { %v2487_v33 = vld [vmem:[%s3123_s10 + $0x14] ss:$8 sps:$4 sm:$0xff]  }
 0x5ee   : > { %v1180_v35 = vsel %vm942_vm3, %v1176_v34, -inf }
 0x5ef   : > { %1181 = vmax.xlane.f32.xlu1 %v1180_v35 }
 0x600   : > { %1251 = vrot.lane.b32.xlu1 %v3217_v22, %s2806_s25 }
 0x678   : > { %v1179_v36 = vpop.xlane.xlu0 %1178 }
 0x679   : > { %v1183_v37 = vsub.f32 %v1175_v23, %v1179_v36 }
 0x67b   : > { %v1185_v38 = vmul.f32 1.442695, %v1183_v37 }
 0x67c   : > { %v1182_v25 = vpop.xlane.xlu1 %1181 }
 0x67d   : > { %2530 = vpow2.f32 %v1185_v38  ;;  %v1184_v39 = vsub.f32 %v1176_v34, %v1182_v25  ;;  %v2485_v34 = vld [vmem:[%s3123_s10 + $0x10] ss:$8 sps:$4 sm:$0xff]  }
 0x67f   : > { %v1187_v40 = vmul.f32 1.442695, %v1184_v39 }
 0x680   : > { %v1252_v41 = vpop.permute.xlu1 %1251 }
 0x681   : > { %2532 = vpow2.f32 %v1187_v40  ;;  %v1257_v42 = vsel %vm970_vm2, %v1252_v41, 0  ;;  %v2490_v40 = vld [vmem:[%s3123_s10 + $0x24] ss:$8 sps:$4 sm:$0xff]   ;;  %v2488_v41 = vld [vmem:[%s3123_s10 + $0x20] ss:$8 sps:$4 sm:$0xff]  }
 0x682   : > { %2305 = vmatpush3.bf16.msra.mxu1 %v1257_v42  ;;  %v2493_v42 = vld [vmem:[%s3123_s10 + $0x34] ss:$8 sps:$4 sm:$0xff]  }
 0x683   : > { %2322 = vmatprep.subr.bf16.mxu1 %v2804_v29 }
 0x687   : > { %v2531_v32 = vpop.eup %2530 }
 0x688   : > { %v1189_v43 = vsel %vm942_vm3, %v2531_v32, 0.0 }
 0x689   : > { %1190 = vadd.xlane.f32.xlu0 %v1189_v43  ;;  %v2496_v43 = vld [vmem:[%s3123_s10 + $0x44] ss:$8 sps:$4 sm:$0xff]  }
 0x68b   : > { %v2533_v22 = vpop.eup %2532 }
 0x68c   : > { %v1192_v44 = vsel %vm942_vm3, %v2533_v22, 0.0 }
 0x68d   : > { %1193 = vadd.xlane.f32.xlu0 %v1192_v44  ;;  %v2499_v44 = vld [vmem:[%s3123_s10 + $0x54] ss:$8 sps:$4 sm:$0xff]  }
 0x6a3   : > { %1202 = vrot.lane.b32.xlu0 %v3213_v18, %s2806_s25  ;;  %v2474_v18 = vld [vmem:[%s3121_s23] sm:$0xff]  }
 0x716   : > { %v1191_v45 = vpop.xlane.xlu0 %1190 }
 0x717   : > { %2534 = vrcp.f32 %v1191_v45  ;;  %v2497_v45 = vld [vmem:[%s3123_s10 + $0x50] ss:$8 sps:$4 sm:$0xff]  }
 0x71a   : > { %v1194_v46 = vpop.xlane.xlu0 %1193 }
 0x71b   : > { %2536 = vrcp.f32 %v1194_v46  ;;  %v2502_v46 = vld [vmem:[%s3123_s10 + $0x64] ss:$8 sps:$4 sm:$0xff]  }
 0x71e   : > { %v1203_v47 = vpop.permute.xlu0 %1202 }
 0x71f   : > { %v1208_v48 = vsel %vm970_vm2, %v1203_v47, 0  ;;  %v2500_v47 = vld [vmem:[%s3123_s10 + $0x60] ss:$8 sps:$4 sm:$0xff]  }
 0x720   : > { %2299 = vmatpush3.bf16.msra.mxu0 %v1208_v48  ;;  %v2505_v48 = vld [vmem:[%s3123_s10 + $0x74] ss:$8 sps:$4 sm:$0xff]  }
 0x721   : > { %v2535_v51 = vpop.eup %2534  ;;  %2310 = vmatprep.subr.bf16.mxu0 %v2804_v29 }
 0x722   : > { %v1197_v52 = vmul.f32 %v2535_v51, %v2531_v32  ;;  %v2491_v32 = vld [vmem:[%s3123_s10 + $0x30] ss:$8 sps:$4 sm:$0xff]  }
 0x723   : > { %v2503_v51 = vld [vmem:[%s3123_s10 + $0x70] ss:$8 sps:$4 sm:$0xff]  }
 0x724   : > { %v1199_v54 = vpack.c.bf16 %v1197_v52, %v1197_v52 }
 0x725   : > { %v2537_v55 = vpop.eup %2536 }
 0x726   : > { %v1198_v58 = vmul.f32 %v2537_v55, %v2533_v22  ;;  %2301 = vmatmul.mubr.msk.bf16.vlgmr.msra.gmra.mrb[16].mxu0 %vm942_vm3, %v1199_v54  ;;  %v2494_v22 = vld [vmem:[%s3123_s10 + $0x40] ss:$8 sps:$4 sm:$0xff]  }
 0x727   : > { %2311 = vmatpush3.bf16.msra.mxu0 %v2478_v53  ;;  %2318 = vmatprep.mubr.msk.bf16.mxu0 %vm2805_vm0, %v2804_v29 }
 0x728   : > { %v1200_v59 = vpack.c.bf16 %v1198_v58, %v1198_v58  ;;  %2312 = vmatprep.subr.bf16.mxu0 %v2804_v29 }
 0x72a   : > { %2307 = vmatmul.mubr.msk.bf16.vlgmr.msra.gmra.mrb[16].mxu1 %vm942_vm3, %v1200_v59 }
 0x72b   : > { %2323 = vmatpush3.bf16.msra.mxu1 %v2474_v18  ;;  %2330 = vmatprep.mubr.msk.bf16.mxu1 %vm2805_vm0, %v2804_v29 }
 0x72c   : > { %2324 = vmatprep.subr.bf16.mxu1 %v2804_v29  ;;  %2313 = vmatpush3.bf16.msra.mxu0 %v2479_v61  ;;  %v2141_v61 = vld [vmem:[%s3134_s15 + $0x4] ss:$0 sm:$0xff] }
 0x72d   : > { %2314 = vmatprep.subr.bf16.mxu0 %v2804_v29 }
 0x72f   : > { %2325 = vmatpush3.bf16.msra.mxu1 %v2475_v62 }
 0x730   : > { %2326 = vmatprep.subr.bf16.mxu1 %v2804_v29  ;;  %2315 = vmatpush3.bf16.msra.mxu0 %v2480_v1 }
 0x731   : > { %2316 = vmatprep.subr.bf16.mxu0 %v2804_v29 }
 0x733   : > { %2327 = vmatpush3.bf16.msra.mxu1 %v2476_v63 }
 0x734   : > { %2328 = vmatprep.subr.bf16.mxu1 %v2804_v29  ;;  %2317 = vmatpush3.bf16.msra.mxu0 %v2481_v2  ;;  %v2142_v2 = vld [vmem:[%s3134_s15 + $0x5] ss:$0 sm:$0xff] }
 0x735   : > { %1601 = vmatprep.subr.bf16.mxu0 %v2484_v31 }
 0x737   : > { %2329 = vmatpush3.bf16.msra.mxu1 %v2477_v0 }
 0x73a   : > { %2331 = vmatmul.mubr.msk.bf16.vlgmr.msra.gmra.mrb[20].mxu1 %vm833_vm1, %v1060_v12 }
 0x7f9   : > { %v1244_v3 = vpop.f32.mrb[16].mxu0 }
 0x7fa   : > { %v2302_v4 = vpop.f32.mrb[17].mxu0 }
 0x7fb   : > { %v1247_v5 = vpop.f32.mrb[18].mxu0 }
 0x7fc   : > { %v2303_v6 = vpop.f32.mrb[19].mxu0 }
 0x7fd   : > { %v1293_v8 = vpop.f32.mrb[16].mxu1 }
 0x7fe   : > { %v1299_v9 = vpack.c.bf16 %v1293_v8, %v1244_v3  ;;  %v2308_v10 = vpop.f32.mrb[17].mxu1  ;;  %v2506_v8 = vld [vmem:[%s3136_s13 + $0x40] sm:$0xff]  }
 0x7ff   : > { %v1296_v13 = vpop.f32.mrb[18].mxu1  ;;  %2220 = vmatprep.subr.bf16.mxu1 %v2506_v8  ;;  %v2508_v10 = vld [vmem:[%s3136_s13 + $0x48] sm:$0xff]  }
 0x800   : > { %v2309_v14 = vpop.f32.mrb[19].mxu1  ;;  %2319 = vmatmul.mubr.msk.bf16.vlgmr.msra.gmra.mrb[20].mxu0 %vm833_vm1, %v1299_v9  ;;  %v2507_v9 = vld [vmem:[%s3136_s13] sm:$0xff]   ;;  %v2509_v13 = vld [vmem:[%s3136_s13 + $0x8] sm:$0xff]  }
 0x801   : > { %1633 = vmatprep.mubr.bf16.mxu0 %v2803_v28  ;;  %1602 = vmatpush1.bf16.msra.mxu0 %v2482_v30  ;;  %v2510_v14 = vld [vmem:[%s3136_s13 + $0x50] sm:$0xff]  }
 0x802   : > { %1603 = vmatprep.subr.bf16.mxu0 %v2487_v33  ;;  %2221 = vmatpush3.bf16.msra.mxu1 %v2507_v9 }
 0x803   : > { %2222 = vmatprep.subr.bf16.mxu1 %v2508_v10 }
 0x805   : > { %1604 = vmatpush1.bf16.msra.mxu0 %v2485_v34 }
 0x806   : > { %1605 = vmatprep.subr.bf16.mxu0 %v2490_v40  ;;  %2223 = vmatpush3.bf16.msra.mxu1 %v2509_v13 }
 0x807   : > { %2224 = vmatprep.subr.bf16.mxu1 %v2510_v14  ;;  %v2159_v14 = vld [vmem:[%s3134_s15 + $0x8] ss:$0 sm:$0xff] }
 0x809   : > { %1606 = vmatpush1.bf16.msra.mxu0 %v2488_v41 }
 0x80a   : > { %1607 = vmatprep.subr.bf16.mxu0 %v2493_v42 }
 0x80d   : > { %v1437_v7 = vpop.f32.mrb[20].mxu1  ;;  %1608 = vmatpush1.bf16.msra.mxu0 %v2491_v32 }
 0x80e   : > { %v2332_v11 = vpop.f32.mrb[21].mxu1  ;;  %1609 = vmatprep.subr.bf16.mxu0 %v2496_v43 }
 0x80f   : > { %v1440_v29 = vpop.f32.mrb[22].mxu1  ;;  %v2512_v11 = vld [vmem:[%s3136_s13 + $0x58] sm:$0xff]  }
 0x810   : > { %v2333_v12 = vpop.f32.mrb[23].mxu1 }
 0x811   : > { %1610 = vmatpush1.bf16.msra.mxu0 %v2494_v22  ;;  %v2514_v12 = vld [vmem:[%s3136_s13 + $0x60] sm:$0xff]  }
 0x812   : > { %1611 = vmatprep.subr.bf16.mxu0 %v2499_v44 }
 0x815   : > { %1612 = vmatpush1.bf16.msra.mxu0 %v2497_v45 }
 0x816   : > { %1613 = vmatprep.subr.bf16.mxu0 %v2502_v46 }
 0x819   : > { %1614 = vmatpush1.bf16.msra.mxu0 %v2500_v47 }
 0x81a   : > { %1615 = vmatprep.subr.bf16.mxu0 %v2505_v48 }
 0x81d   : > { %1616 = vmatpush1.bf16.msra.mxu0 %v2503_v51 }
 0x8d3   : > { %v1369_v16 = vpop.f32.mrb[20].mxu0 }
 0x8d4   : > { %v1438_v17 = vadd.f32 %v1437_v7, %v1369_v16  ;;  %v2320_v19 = vpop.f32.mrb[21].mxu0  ;;  %v2511_v7 = vld [vmem:[%s3136_s13 + $0x10] sm:$0xff]   ;;  %v2516_v16 = vld [vmem:[%s3136_s13 + $0x68] sm:$0xff]  }
 0x8d5   : > { %v1372_v20 = vpop.f32.mrb[22].mxu0  ;;  %2225 = vmatpush3.bf16.msra.mxu1 %v2511_v7  ;;  %v2518_v19 = vld [vmem:[%s3136_s13 + $0x70] sm:$0xff]  }
 0x8d6   : > { %v1450_v21 = vadd.f32 %v2140_v15, %v1438_v17  ;;  %v1441_v23 = vadd.f32 %v1440_v29, %v1372_v20  ;;  %v2321_v24 = vpop.f32.mrb[23].mxu0  ;;  %v2513_v29 = vld [vmem:[%s3136_s13 + $0x18] sm:$0xff]   ;;  %2226 = vmatprep.subr.bf16.mxu1 %v2512_v11  ;;  %v2517_v17 = vld [vmem:[%s3136_s13 + $0x28] sm:$0xff]   ;;  %v2519_v20 = vld [vmem:[%s3136_s13 + $0x30] sm:$0xff]  }
 0x8d7   : > { %v562_v24 = vld [vmem:[%s3134_s15 + $0x6] sm:$0x3] }
 0x8d8   : > { %v1451_v26 = vadd.f32 %v2140_v15, %v1441_v23  ;;  %v1452_v27 = vadd.f32 %v1450_v21, %v3171_v49  ;;  %v2515_v15 = vld [vmem:[%s3136_s13 + $0x20] sm:$0xff]   ;;  %v2520_v21 = vld [vmem:[%s3136_s13 + $0x78] sm:$0xff]  }
 0x8d9   : > { %2227 = vmatpush3.bf16.msra.mxu1 %v2513_v29  ;;  %v2521_v23 = vld [vmem:[%s3136_s13 + $0x38] sm:$0xff]  }
 0x8da   : > { %1454 = vadd.xlane.f32.xlu1 %v1452_v27  ;;  %v1453_v28 = vadd.f32 %v1451_v26, %v3173_v50  ;;  %2228 = vmatprep.subr.bf16.mxu1 %v2514_v12  ;;  %v1514_v26 = vrot.slane %v562_v24, %v602_v60 }
 0x8dc   : > { %1456 = vadd.xlane.f32.xlu0 %v1453_v28 }
 0x8dd   : > { %2229 = vmatpush3.bf16.msra.mxu1 %v2515_v15 }
 0x8de   : > { %2230 = vmatprep.subr.bf16.mxu1 %v2516_v16 }
 0x8e1   : > { %2231 = vmatpush3.bf16.msra.mxu1 %v2517_v17 }
 0x8e2   : > { %2232 = vmatprep.subr.bf16.mxu1 %v2518_v19 }
 0x8e5   : > { %2233 = vmatpush3.bf16.msra.mxu1 %v2519_v20 }
 0x8e6   : > { %2234 = vmatprep.subr.bf16.mxu1 %v2520_v21 }
 0x8e9   : > { %2235 = vmatpush3.bf16.msra.mxu1 %v2521_v23 }
 0x967   : > { %v1455_v35 = vpop.xlane.xlu1 %1454 }
 0x968   : > { %v1459_v36 = vmul.f32 0.0078125, %v1455_v35 }
 0x969   : > { %v1457_v37 = vpop.xlane.xlu0 %1456 }
 0x96a   : > { %v1461_v49 = vsub.f32 %v1452_v27, %v1459_v36  ;;  %v1460_v50 = vmul.f32 0.0078125, %v1457_v37  ;;  %v1518_v27 = vrot.slane %v562_v24, %v606_v57 }
 0x96c   : > { %v1462_v38 = vsub.f32 %v1453_v28, %v1460_v50  ;;  %v1463_v25 = vmul.f32 %v1461_v49, %v1461_v49 }
 0x96e   : > { %1465 = vadd.xlane.f32.xlu0 %v1463_v25  ;;  %v1464_v39 = vmul.f32 %v1462_v38, %v1462_v38 }
 0x970   : > { %1467 = vadd.xlane.f32.xlu1 %v1464_v39 }
 0x9fb   : > { %v1466_v52 = vpop.xlane.xlu0 %1465 }
 0x9fc   : > { %v1469_v53 = vmul.f32 0.0078125, %v1466_v52 }
 0x9fd   : > { %v1468_v54 = vpop.xlane.xlu1 %1467 }
 0x9fe   : > { %v1471_v55 = vadd.f32 1e-12, %v1469_v53  ;;  %v1470_v58 = vmul.f32 0.0078125, %v1468_v54 }
 0xa00   : > { %2538 = vrsqrt.f32 %v1471_v55  ;;  %v1472_v18 = vadd.f32 1e-12, %v1470_v58 }
 0xa02   : > { %2540 = vrsqrt.f32 %v1472_v18 }
 0xa0a   : > { %v2539_v59 = vpop.eup %2538 }
 0xa0b   : > { %v1475_v62 = vmul.f32 %v2539_v59, %v1461_v49 }
 0xa0c   : > { %v2541_v63 = vpop.eup %2540 }
 0xa0d   : > { %v1476_v0 = vmul.f32 %v2541_v63, %v1462_v38  ;;  %v1483_v1 = vmul.f32 %v2141_v61, %v1475_v62 }
 0xa0f   : > { %v1484_v3 = vmul.f32 %v2141_v61, %v1476_v0  ;;  %v3325_v4 = vadd.f32 %v2142_v2, %v1483_v1 }
 0xa11   : > { %v3327_v5 = vadd.f32 %v2142_v2, %v1484_v3 }
 0xa13   : > { %v1493_v6 = vpack.c.bf16 %v3327_v5, %v3325_v4 }
 0xa15   : > { %1634 = vmatmul.mubr.bf16.vlgmr.msra.gmra.mrb[24].mxu0 %v1493_v6 }
 0xae8   : > { %v1635_v28 = vpop.f32.mrb[24].mxu0 }
 0xae9   : > { %v1636_v30 = vadd.f32 %v1635_v28, %v1514_v26  ;;  %v1637_v31 = vpop.f32.mrb[25].mxu0 }
 0xaea   : > { %v1638_v33 = vadd.f32 %v1637_v31, %v1518_v27  ;;  %v1639_v34 = vpop.f32.mrb[26].mxu0 }
 0xaeb   : > { %v1648_v35 = vmul.f32 0.044715, %v1636_v30  ;;  %v1640_v36 = vadd.f32 %v1639_v34, %v1514_v26  ;;  %v1641_v37 = vpop.f32.mrb[27].mxu0  ;;  %v1644_v59 = vmul.f32 0.5, %v1636_v30 }
 0xaec   : > { %v1649_v49 = vmul.f32 0.044715, %v1638_v33  ;;  %v1642_v50 = vadd.f32 %v1641_v37, %v1518_v27  ;;  %v1645_v63 = vmul.f32 0.5, %v1638_v33 }
 0xaed   : > { %v1652_v38 = vmul.f32 %v1648_v35, %v1636_v30  ;;  %v1650_v25 = vmul.f32 0.044715, %v1640_v36  ;;  %v1646_v61 = vmul.f32 0.5, %v1640_v36 }
 0xaee   : > { %v1653_v39 = vmul.f32 %v1649_v49, %v1638_v33  ;;  %v1651_v40 = vmul.f32 0.044715, %v1642_v50  ;;  %v1647_v0 = vmul.f32 0.5, %v1642_v50  ;;  %v2176_v49 = vld [vmem:[%s3134_s15 + $0x9] ss:$0 sm:$0xff] }
 0xaef   : > { %v1656_v41 = vmul.f32 %v1652_v38, %v1636_v30  ;;  %v1654_v42 = vmul.f32 %v1650_v25, %v1640_v36  ;;  %v2177_v25 = vld [vmem:[%s3134_s15 + $0xa] ss:$0 sm:$0xff] }
 0xaf0   : > { %v1657_v60 = vmul.f32 %v1653_v39, %v1638_v33  ;;  %v1655_v32 = vmul.f32 %v1651_v40, %v1642_v50 }
 0xaf1   : > { %v1660_v56 = vadd.f32 %v1656_v41, %v1636_v30  ;;  %v1658_v57 = vmul.f32 %v1654_v42, %v1640_v36 }
 0xaf2   : > { %v1659_v43 = vmul.f32 %v1655_v32, %v1642_v50  ;;  %v1661_v22 = vadd.f32 %v1657_v60, %v1638_v33 }
 0xaf3   : > { %v1664_v44 = vmul.f32 0.7978846, %v1660_v56  ;;  %v1662_v45 = vadd.f32 %v1658_v57, %v1640_v36 }
 0xaf4   : > { %v1663_v46 = vadd.f32 %v1659_v43, %v1642_v50  ;;  %v1665_v47 = vmul.f32 0.7978846, %v1661_v22 }
 0xaf5   : > { %2542 = vtanh.f32 %v1664_v44  ;;  %v1666_v48 = vmul.f32 0.7978846, %v1662_v45 }
 0xaf6   : > { %v1667_v51 = vmul.f32 0.7978846, %v1663_v46  ;;  %2544 = vtanh.f32 %v1665_v47 }
 0xaf7   : > { %2546 = vtanh.f32 %v1666_v48 }
 0xaf8   : > { %2548 = vtanh.f32 %v1667_v51 }
 0xaff   : > { %v2543_v52 = vpop.eup %2542 }
 0xb00   : > { %v2545_v53 = vpop.eup %2544  ;;  %v1672_v54 = vadd.f32 1.0, %v2543_v52 }
 0xb01   : > { %v2547_v55 = vpop.eup %2546  ;;  %v1673_v58 = vadd.f32 1.0, %v2545_v53 }
 0xb02   : > { %v2549_v18 = vpop.eup %2548  ;;  %v1674_v62 = vadd.f32 1.0, %v2547_v55  ;;  %v1676_v2 = vmul.f32 %v1672_v54, %v1644_v59 }
 0xb03   : > { %v1675_v1 = vadd.f32 1.0, %v2549_v18  ;;  %v1677_v6 = vmul.f32 %v1673_v58, %v1645_v63 }
 0xb04   : > { %v1678_v3 = vmul.f32 %v1674_v62, %v1646_v61 }
 0xb05   : > { %v1679_v8 = vmul.f32 %v1675_v1, %v1647_v0 }
 0xb06   : > { %v1680_v9 = vpack.c.bf16 %v1678_v3, %v1676_v2 }
 0xb07   : > { %v1681_v10 = vpack.c.bf16 %v1679_v8, %v1677_v6 }
 0xb09   : > { %1848 = vmatprep.mubr.bf16.mxu1 %v1681_v10 }
 0xb0a   : > { %1849 = vmatmul.mubr.bf16.vlgmr.msra.gmra.mrb[24].mxu1 %v1680_v9 }
 0xbdd   : > { %v2236_v13 = vpop.f32.mrb[24].mxu1 }
 0xbde   : > { %v2237_v7 = vpop.f32.mrb[25].mxu1 }
 0xbdf   : > { %v2238_v11 = vadd.f32 %v2237_v7, %v2236_v13  ;;  %v2239_v29 = vpop.f32.mrb[26].mxu1 }
 0xbe0   : > { %v2240_v12 = vpop.f32.mrb[27].mxu1 }
 0xbe1   : > { %v1851_v15 = vadd.f32 %v2238_v11, %v2159_v14  ;;  %v2241_v16 = vadd.f32 %v2240_v12, %v2239_v29 }
 0xbe3   : > { %v1854_v17 = vadd.f32 %v2241_v16, %v2159_v14  ;;  %v1857_v19 = vadd.f32 %v1851_v15, %v3325_v4 }
 0xbe5   : > { %1859 = vadd.xlane.f32.xlu0 %v1857_v19  ;;  %v1858_v20 = vadd.f32 %v1854_v17, %v3327_v5 }
 0xbe7   : > { %1861 = vadd.xlane.f32.xlu1 %v1858_v20 }
 0xc72   : > { %v1860_v21 = vpop.xlane.xlu0 %1859 }
 0xc73   : > { %v1863_v23 = vmul.f32 0.0078125, %v1860_v21 }
 0xc74   : > { %v1862_v24 = vpop.xlane.xlu1 %1861 }
 0xc75   : > { %v1865_v26 = vsub.f32 %v1857_v19, %v1863_v23  ;;  %v1864_v27 = vmul.f32 0.0078125, %v1862_v24 }
 0xc77   : > { %v1866_v28 = vsub.f32 %v1858_v20, %v1864_v27  ;;  %v1867_v30 = vmul.f32 %v1865_v26, %v1865_v26 }
 0xc79   : > { %1869 = vadd.xlane.f32.xlu0 %v1867_v30  ;;  %v1868_v31 = vmul.f32 %v1866_v28, %v1866_v28 }
 0xc7b   : > { %1871 = vadd.xlane.f32.xlu1 %v1868_v31 }
 0xd06   : > { %v1870_v33 = vpop.xlane.xlu0 %1869 }
 0xd07   : > { %v1873_v34 = vmul.f32 0.0078125, %v1870_v33 }
 0xd08   : > { %v1872_v35 = vpop.xlane.xlu1 %1871 }
 0xd09   : > { %v1875_v4 = vadd.f32 1e-12, %v1873_v34  ;;  %v1874_v36 = vmul.f32 0.0078125, %v1872_v35 }
 0xd0b   : > { %2550 = vrsqrt.f32 %v1875_v4  ;;  %v1876_v5 = vadd.f32 1e-12, %v1874_v36 }
 0xd0d   : > { %2552 = vrsqrt.f32 %v1876_v5 }
 0xd15   : > { %v2551_v37 = vpop.eup %2550 }
 0xd16   : > { %v1879_v50 = vmul.f32 %v2551_v37, %v1865_v26 }
 0xd17   : > { %v2553_v38 = vpop.eup %2552 }
 0xd18   : > { %v1880_v39 = vmul.f32 %v2553_v38, %v1866_v28  ;;  %v1887_v40 = vmul.f32 %v2176_v49, %v1879_v50 }
 0xd1a   : > { %v1888_v41 = vmul.f32 %v2176_v49, %v1880_v39  ;;  %v1895_v42 = vadd.f32 %v2177_v25, %v1887_v40 }
 0xd1c   : > { %v1896_v60 = vadd.f32 %v2177_v25, %v1888_v41  ;;  %1897 = vst [vmem:[#allocation11] sm:$0xff] %v1895_v42 }
 0xd1e   : > { %1898 = vst [vmem:[#allocation11 + $0x8] sm:$0xff] %v1896_v60 }
 0xd1f   : > { %2715 = shalt.err (!%p2712_p0)
}
 0xd20   : > { %s3448_s23 = sld [smem:[#allocation23_spill]] }
 0xd26   : > { %s2716_s3 = scalar_lea.hbm %s3448_s23, 256 }
 0xd27   : > { %p2717_p7 = scmp.ne.s32.totalorder %s3448_s23, %s2716_s3  ;;  %p2722_p4 = scmp.lt.u32.totalorder %s2716_s3, %s3448_s23 }
 0xd29   : > { %p2718_p1 = pnand %p2717_p7, %p2374_p11 }
 0xd2b   : > { %p2719_p12 = pneg %p2718_p1 }
 0xd2d   : > { %p2724_p8 = pnand %p2722_p4, %p2719_p12 }
 0xd2f   : > { %2727 = shalt.err (!%p2724_p8)
}
 0xd30   : > { %s2808_s16 = smov 128   ;;  %s2809_s15 = smov 8  }
 0xd31   : > { %2351 = dma.vmem_to_hbm [thread:$0]  (%p2374_p11), %s1909_s9, 256, %s3448_s23, [#allocation4], %s2808_s16, %s2808_s16, %s2809_s15  }
 0xd32   : > { %2765 = dma.done.wait (%p2374_p11), [#allocation4], 256  }
 0xd33   : > { %2767 = vsyncadd (%p2374_p11), [#allocation4], 4294967040 }
 0xd34 PF: > { %s3449_s11 = sld [smem:[#allocation18_spill]]  ;;  %s3450_s29 = sld [smem:[#allocation16_spill]] }
 0xd35   : > { %s3451_s5 = sld [smem:[#allocation20_spill]]  ;;  %s3452_s30 = sld [smem:[#allocation17_spill]] }
 0xd36   : > { %s3453_s9 = sld [smem:[#allocation19_spill]]  ;;  %s3454_s27 = smov %s2774_s28 }
 0xd3a   : > { %s26_s10 = sadd.s32 1, %s3449_s11   ;;  %s3455_s28 = smov %s3450_s29 }
 0xd3b   : > { %p23_p5 = scmp.ge.s32.totalorder %s26_s10, 4   ;;  %s3456_s29 = smov %s3451_s5 }
 0xd3d   :  { %25 = sbr.rel (!%p23_p5) target bundleno = 12 (0xc), region = 141 }
 0xd44   :  { %1924 = vsyncpa [#allocation3], 1 }
 0xd45   :  { %1926 = vsyncpa [#allocation3 + $0x1], 1 }
 0xd46   :  { %1927 = vsyncpa [#allocation6], 1 }
 0xd47   :  { %1929 = vsyncpa [#allocation6 + $0x1], 1 }
 0xd48   :  { %1930 = vsyncpa [#allocation9], 1 }
 0xd49   :  { %1932 = vsyncpa [#allocation9 + $0x1], 1 }
 0xd4a   :  { %1933 = vsyncpa [#allocation4], 1 }
 0xd4b   :  { %1935 = vsyncpa [#allocation4 + $0x1], 1 }

</bundles_post_ra>
